<compile_context>
chip_gen: v5e
topology: v5e:2x2
jax: 0.10.0
libtpu: 0.0.40
codegen_flags: <defaults>
</compile_context>

<pallas_src>
import functools

import jax
import jax.numpy as jnp
from jax.experimental import pallas as pl
from jax.experimental.pallas import tpu as pltpu


def _round_up(x, m):
    return (x + m - 1) // m * m


def _aet_fused_kernel(mel_ref, wav_ref, cwt_ref, cb_ref,
                      fcw_ref, fcb_ref, chwt_ref, chb_ref, out_ref,
                      *, T, MT, MTp, Lp, Lo, C_enc, D_ch, K):
    """Bt batch rows per grid step: conv encoder + channelfeats + chfeats-cond. FIR."""
    Bt = mel_ref.shape[0]
    inv_MT = 1.0 / MT

    # ---------------- encoder_src: 3x3 'same' conv (1 -> C_enc) + ReLU + avg pool ----
    xf = mel_ref[...]                                          # (Bt, MTp) flattened (mel, time)
    lane = jax.lax.broadcasted_iota(jnp.int32, (1, MTp), 1)
    if (T & (T - 1)) == 0:                                     # time index = lane % T (in-kernel)
        t_idx = lane & (T - 1)
    else:
        t_idx = lane - (lane // T) * T

    # Hoisted edge masks (computed once per grid step; only 4 are non-trivial).
    ok_t = {-1: t_idx >= 1, 0: None, 1: t_idx < (T - 1)}       # time-edge validity
    ok_m = {-1: lane >= T, 0: None, 1: lane < (MT - T)}        # mel-edge validity

    # 9 shifted, zero-padded patches, built once and reused across output channels.
    patches = []
    for dh in range(3):                                        # offset along time (torch H)
        for dw in range(3):                                    # offset along mel  (torch W)
            t_off, m_off = dh - 1, dw - 1
            s = m_off * T + t_off                              # flat shift in (mel, time) order
            rolled = xf if s == 0 else pltpu.roll(xf, shift=(-s) % MTp, axis=1)
            parts = [m for m in (ok_t[t_off], ok_m[m_off]) if m is not None]
            if parts:
                valid = parts[0] if len(parts) == 1 else (parts[0] & parts[1])
                patches.append(jnp.where(valid, rolled, 0.0))  # (Bt, MTp)
            else:
                patches.append(rolled)

    live = None if MTp == MT else (lane < MT)                  # exclude MT-padding from pooling

    # chfeats accumulated directly (no concat):  chf[b,d] = tanh(sum_c pooled[b,c]*fc_w[c,d]+fc_b[d])
    chf = jnp.zeros((Bt, D_ch), jnp.float32) + fcb_ref[...]
    for c in range(C_enc):
        h = jnp.zeros((Bt, MTp), jnp.float32)
        for r in range(9):
            h = h + patches[r] * cwt_ref[c, r]                 # scalar (SMEM) * vector FMA
        h = jnp.maximum(h + cb_ref[c, 0], 0.0)                 # ReLU
        if live is not None:
            h = jnp.where(live, h, 0.0)
        pooled_c = jnp.sum(h, axis=1, keepdims=True) * inv_MT  # (Bt, 1) global average pool
        chf = chf + pooled_c * fcw_ref[c:c + 1, :]             # (Bt, D_ch)
    chf = jnp.tanh(chf)                                        # chfeats never leaves VMEM

    # ---------------- channel_src: chfeats-conditioned K-tap FIR ('same') ------------
    taps = jnp.zeros((Bt, K), jnp.float32) + chb_ref[...]      # (Bt, K)
    for d in range(D_ch):
        taps = taps + chf[:, d:d + 1] * chwt_ref[d:d + 1, :]

    # Unmasked FIR: wav was zero-padded to Lp >= L + pad_l, so every out-of-range read
    # (left wrap-around and right overrun) lands in the zero tail -> exact 'same' padding.
    wav = wav_ref[...]                                         # (Bt, Lp)
    pad_l = (K - 1) // 2
    acc = jnp.zeros((Bt, Lp), jnp.float32)
    for k in range(K):                                         # statically unrolled taps
        sh = k - pad_l
        rolled = wav if sh == 0 else pltpu.roll(wav, shift=(-sh) % Lp, axis=1)
        acc = acc + rolled * taps[:, k:k + 1]                  # 1 mul + 1 add per tap
    out_ref[...] = acc[:, :Lo]                                 # lane-dense (128-aligned) store


def init_params(key, C_enc, D_ch, K):
    k1, k2, k3, k4, k5, k6 = jax.random.split(key, 6)
    return {
        # conv weight stored as (C_enc, 9): column dh*3+dw == torch W[c, 0, dh, dw]
        "conv_w": 0.1 * jax.random.normal(k1, (C_enc, 9), jnp.float32),
        "conv_b": 0.1 * jax.random.normal(k2, (C_enc, 1), jnp.float32),
        "fc_w":   0.1 * jax.random.normal(k3, (C_enc, D_ch), jnp.float32),
        "fc_b":   0.1 * jax.random.normal(k4, (1, D_ch), jnp.float32),
        # taps[k] = sum_d chfeats[d] * ch_w[k, d] + ch_b[k]
        "ch_w":   0.1 * jax.random.normal(k5, (K, D_ch), jnp.float32),
        "ch_b":   0.1 * jax.random.normal(k6, (K, 1), jnp.float32),
    }


def aet_forward(melspecs_src, wavsaux_tar, params):
    B, n_mels, T = melspecs_src.shape
    L = wavsaux_tar.shape[1]
    MT = n_mels * T
    C_enc, D_ch = params["fc_w"].shape
    K = params["ch_w"].shape[0]
    pad_l = (K - 1) // 2

    # Lane-dense padding (all multiples of 128); Lp also carries >= pad_l zeros so the
    # in-kernel FIR needs no boundary masks at all.
    MTp = _round_up(MT, 128)
    Lp = _round_up(L + pad_l, 128)
    Lo = _round_up(L, 128)

    # Sublane batching: 8 batch rows per grid step (grid >= 2 keeps both v7x TCs busy
    # at realistic B); for tiny B use the whole batch in one step (full-dim block).
    if B <= 8:
        Bt, Bp = B, B
    else:
        Bt, Bp = 8, _round_up(B, 8)

    mel = melspecs_src.astype(jnp.float32).reshape(B, MT)
    wav = wavsaux_tar.astype(jnp.float32)
    if Bp != B or MTp != MT:
        mel = jnp.pad(mel, ((0, Bp - B), (0, MTp - MT)))
    wav = jnp.pad(wav, ((0, Bp - B), (0, Lp - L)))

    kernel = functools.partial(_aet_fused_kernel, T=T, MT=MT, MTp=MTp, Lp=Lp, Lo=Lo,
                               C_enc=C_enc, D_ch=D_ch, K=K)

    out = pl.pallas_call(
        kernel,
        out_shape=jax.ShapeDtypeStruct((Bp, Lo), jnp.float32),
        grid_spec=pltpu.PrefetchScalarGridSpec(
            num_scalar_prefetch=0,
            grid=(Bp // Bt,),
            in_specs=[
                pl.BlockSpec((Bt, MTp), lambda i: (i, 0)),              # mel (flattened image)
                pl.BlockSpec((Bt, Lp), lambda i: (i, 0)),               # zero-padded waveform
                pl.BlockSpec(memory_space=pltpu.MemorySpace.SMEM),      # conv_w (scalars)
                pl.BlockSpec(memory_space=pltpu.MemorySpace.SMEM),      # conv_b (scalars)
                pl.BlockSpec((C_enc, D_ch), lambda i: (0, 0)),          # fc_w
                pl.BlockSpec((1, D_ch), lambda i: (0, 0)),              # fc_b
                pl.BlockSpec((D_ch, K), lambda i: (0, 0)),              # ch_w (transposed)
                pl.BlockSpec((1, K), lambda i: (0, 0)),                 # ch_b
            ],
            out_specs=pl.BlockSpec((Bt, Lo), lambda i: (i, 0)),
        ),
        compiler_params=pltpu.CompilerParams(dimension_semantics=("parallel",)),
    )(mel, wav,
      params["conv_w"], params["conv_b"],
      params["fc_w"], params["fc_b"],
      params["ch_w"].T, params["ch_b"].reshape(1, K))

    return out[:B, :L]                                                  # (B, L)


if __name__ == "__main__":
    B, n_mels, T = 16, 16, 16     # melspecs_src: (B, n_mels, T) -> MT = 256
    L = 256                       # wavsaux_tar : (B, L)
    C_enc, D_ch, K = 8, 4, 9

    key = jax.random.PRNGKey(0)
    k_mel, k_wav, k_par = jax.random.split(key, 3)
    melspecs_src = jax.random.normal(k_mel, (B, n_mels, T), jnp.float32)
    wavsaux_tar = jax.random.normal(k_wav, (B, L), jnp.float32)
    params = init_params(k_par, C_enc, D_ch, K)

    wavschmatch_tar = aet_forward(melspecs_src, wavsaux_tar, params)
    jax.block_until_ready(wavschmatch_tar)
    assert wavschmatch_tar.shape == (B, L)
    print("KERNEL_OK")
</pallas_src>

<mosaic_0001>
module attributes {stable_mosaic.version = 11 : i64} {
  func.func @_aet_fused_kernel(%arg0: i32, %arg1: memref<8x256xf32, #tpu.memory_space<vmem>>, %arg2: memref<8x384xf32, #tpu.memory_space<vmem>>, %arg3: memref<8x9xf32, #tpu.memory_space<smem>>, %arg4: memref<8x1xf32, #tpu.memory_space<smem>>, %arg5: memref<8x4xf32, #tpu.memory_space<vmem>>, %arg6: memref<1x4xf32, #tpu.memory_space<vmem>>, %arg7: memref<4x9xf32, #tpu.memory_space<vmem>>, %arg8: memref<1x9xf32, #tpu.memory_space<vmem>>, %arg9: memref<8x256xf32, #tpu.memory_space<vmem>>) attributes {dimension_semantics = [#tpu.dimension_semantics<parallel>], iteration_bounds = array<i64: 2>, scalar_prefetch = 0 : i64, scratch_operands = 0 : i64, tpu.core_type = #tpu.core_type<tc>, window_params = [{transform_indices = @transform_0, window_bounds = array<i64: 8, 256>}, {transform_indices = @transform_1, window_bounds = array<i64: 8, 384>}, {transform_indices = @transform_2, window_bounds = array<i64: 8, 9>}, {transform_indices = @transform_3, window_bounds = array<i64: 8, 1>}, {pipeline_mode = #tpu.pipeline_mode<synchronous>, transform_indices = @transform_4, window_bounds = array<i64: 8, 4>}, {pipeline_mode = #tpu.pipeline_mode<synchronous>, transform_indices = @transform_5, window_bounds = array<i64: 1, 4>}, {pipeline_mode = #tpu.pipeline_mode<synchronous>, transform_indices = @transform_6, window_bounds = array<i64: 4, 9>}, {pipeline_mode = #tpu.pipeline_mode<synchronous>, transform_indices = @transform_7, window_bounds = array<i64: 1, 9>}, {transform_indices = @transform_8, window_bounds = array<i64: 8, 256>}]} {
    %c0 = arith.constant 0 : index
    %c0_0 = arith.constant 0 : index
    %0 = vector.load %arg1[%c0, %c0_0] : memref<8x256xf32, #tpu.memory_space<vmem>>, vector<8x256xf32>
    %1 = tpu.iota {dimensions = array<i32: 1>} : vector<1x256xi32>
    %c15_i32 = arith.constant 15 : i32
    %2 = vector.broadcast %c15_i32 : i32 to vector<1x256xi32>
    %3 = arith.andi %1, %2 : vector<1x256xi32>
    %c1_i32 = arith.constant 1 : i32
    %4 = vector.broadcast %c1_i32 : i32 to vector<1x256xi32>
    %5 = arith.cmpi sge, %3, %4 : vector<1x256xi32>
    %c15_i32_1 = arith.constant 15 : i32
    %6 = vector.broadcast %c15_i32_1 : i32 to vector<1x256xi32>
    %7 = arith.cmpi slt, %3, %6 : vector<1x256xi32>
    %c16_i32 = arith.constant 16 : i32
    %8 = vector.broadcast %c16_i32 : i32 to vector<1x256xi32>
    %9 = arith.cmpi sge, %1, %8 : vector<1x256xi32>
    %c240_i32 = arith.constant 240 : i32
    %10 = vector.broadcast %c240_i32 : i32 to vector<1x256xi32>
    %11 = arith.cmpi slt, %1, %10 : vector<1x256xi32>
    %c17_i32 = arith.constant 17 : i32
    %12 = tpu.dynamic_rotate %0 by %c17_i32 dim 1 : vector<8x256xf32>, i32 -> vector<8x256xf32>
    %13 = arith.andi %5, %9 : vector<1x256xi1>
    %cst = arith.constant 0.000000e+00 : f32
    %14 = vector.shape_cast %13 : vector<1x256xi1> to vector<1x256xi1>
    %15 = vector.broadcast %14 : vector<1x256xi1> to vector<8x256xi1>
    %16 = vector.broadcast %cst : f32 to vector<8x256xf32>
    %17 = arith.select %15, %12, %16 : vector<8x256xi1>, vector<8x256xf32>
    %c1_i32_2 = arith.constant 1 : i32
    %18 = tpu.dynamic_rotate %0 by %c1_i32_2 dim 1 : vector<8x256xf32>, i32 -> vector<8x256xf32>
    %cst_3 = arith.constant 0.000000e+00 : f32
    %19 = vector.shape_cast %5 : vector<1x256xi1> to vector<1x256xi1>
    %20 = vector.broadcast %19 : vector<1x256xi1> to vector<8x256xi1>
    %21 = vector.broadcast %cst_3 : f32 to vector<8x256xf32>
    %22 = arith.select %20, %18, %21 : vector<8x256xi1>, vector<8x256xf32>
    %c241_i32 = arith.constant 241 : i32
    %23 = tpu.dynamic_rotate %0 by %c241_i32 dim 1 : vector<8x256xf32>, i32 -> vector<8x256xf32>
    %24 = arith.andi %5, %11 : vector<1x256xi1>
    %cst_4 = arith.constant 0.000000e+00 : f32
    %25 = vector.shape_cast %24 : vector<1x256xi1> to vector<1x256xi1>
    %26 = vector.broadcast %25 : vector<1x256xi1> to vector<8x256xi1>
    %27 = vector.broadcast %cst_4 : f32 to vector<8x256xf32>
    %28 = arith.select %26, %23, %27 : vector<8x256xi1>, vector<8x256xf32>
    %c16_i32_5 = arith.constant 16 : i32
    %29 = tpu.dynamic_rotate %0 by %c16_i32_5 dim 1 : vector<8x256xf32>, i32 -> vector<8x256xf32>
    %cst_6 = arith.constant 0.000000e+00 : f32
    %30 = vector.shape_cast %9 : vector<1x256xi1> to vector<1x256xi1>
    %31 = vector.broadcast %30 : vector<1x256xi1> to vector<8x256xi1>
    %32 = vector.broadcast %cst_6 : f32 to vector<8x256xf32>
    %33 = arith.select %31, %29, %32 : vector<8x256xi1>, vector<8x256xf32>
    %c240_i32_7 = arith.constant 240 : i32
    %34 = tpu.dynamic_rotate %0 by %c240_i32_7 dim 1 : vector<8x256xf32>, i32 -> vector<8x256xf32>
    %cst_8 = arith.constant 0.000000e+00 : f32
    %35 = vector.shape_cast %11 : vector<1x256xi1> to vector<1x256xi1>
    %36 = vector.broadcast %35 : vector<1x256xi1> to vector<8x256xi1>
    %37 = vector.broadcast %cst_8 : f32 to vector<8x256xf32>
    %38 = arith.select %36, %34, %37 : vector<8x256xi1>, vector<8x256xf32>
    %c15_i32_9 = arith.constant 15 : i32
    %39 = tpu.dynamic_rotate %0 by %c15_i32_9 dim 1 : vector<8x256xf32>, i32 -> vector<8x256xf32>
    %40 = arith.andi %7, %9 : vector<1x256xi1>
    %cst_10 = arith.constant 0.000000e+00 : f32
    %41 = vector.shape_cast %40 : vector<1x256xi1> to vector<1x256xi1>
    %42 = vector.broadcast %41 : vector<1x256xi1> to vector<8x256xi1>
    %43 = vector.broadcast %cst_10 : f32 to vector<8x256xf32>
    %44 = arith.select %42, %39, %43 : vector<8x256xi1>, vector<8x256xf32>
    %c255_i32 = arith.constant 255 : i32
    %45 = tpu.dynamic_rotate %0 by %c255_i32 dim 1 : vector<8x256xf32>, i32 -> vector<8x256xf32>
    %cst_11 = arith.constant 0.000000e+00 : f32
    %46 = vector.shape_cast %7 : vector<1x256xi1> to vector<1x256xi1>
    %47 = vector.broadcast %46 : vector<1x256xi1> to vector<8x256xi1>
    %48 = vector.broadcast %cst_11 : f32 to vector<8x256xf32>
    %49 = arith.select %47, %45, %48 : vector<8x256xi1>, vector<8x256xf32>
    %c239_i32 = arith.constant 239 : i32
    %50 = tpu.dynamic_rotate %0 by %c239_i32 dim 1 : vector<8x256xf32>, i32 -> vector<8x256xf32>
    %51 = arith.andi %7, %11 : vector<1x256xi1>
    %cst_12 = arith.constant 0.000000e+00 : f32
    %52 = vector.shape_cast %51 : vector<1x256xi1> to vector<1x256xi1>
    %53 = vector.broadcast %52 : vector<1x256xi1> to vector<8x256xi1>
    %54 = vector.broadcast %cst_12 : f32 to vector<8x256xf32>
    %55 = arith.select %53, %50, %54 : vector<8x256xi1>, vector<8x256xf32>
    %cst_13 = arith.constant 0.000000e+00 : f32
    %56 = vector.broadcast %cst_13 : f32 to vector<8x4xf32>
    %c0_14 = arith.constant 0 : index
    %c0_15 = arith.constant 0 : index
    %57 = vector.load %arg6[%c0_14, %c0_15] : memref<1x4xf32, #tpu.memory_space<vmem>>, vector<1x4xf32>
    %58 = vector.broadcast %57 : vector<1x4xf32> to vector<8x4xf32>
    %59 = arith.addf %56, %58 : vector<8x4xf32>
    %cst_16 = arith.constant 0.000000e+00 : f32
    %60 = vector.broadcast %cst_16 : f32 to vector<8x256xf32>
    %c0_17 = arith.constant 0 : index
    %c0_18 = arith.constant 0 : index
    %61 = memref.load %arg3[%c0_17, %c0_18] : memref<8x9xf32, #tpu.memory_space<smem>>
    %62 = vector.broadcast %61 : f32 to vector<8x256xf32>
    %63 = arith.mulf %17, %62 : vector<8x256xf32>
    %64 = arith.addf %60, %63 : vector<8x256xf32>
    %c0_19 = arith.constant 0 : index
    %c1 = arith.constant 1 : index
    %65 = memref.load %arg3[%c0_19, %c1] : memref<8x9xf32, #tpu.memory_space<smem>>
    %66 = vector.broadcast %65 : f32 to vector<8x256xf32>
    %67 = arith.mulf %22, %66 : vector<8x256xf32>
    %68 = arith.addf %64, %67 : vector<8x256xf32>
    %c0_20 = arith.constant 0 : index
    %c2 = arith.constant 2 : index
    %69 = memref.load %arg3[%c0_20, %c2] : memref<8x9xf32, #tpu.memory_space<smem>>
    %70 = vector.broadcast %69 : f32 to vector<8x256xf32>
    %71 = arith.mulf %28, %70 : vector<8x256xf32>
    %72 = arith.addf %68, %71 : vector<8x256xf32>
    %c0_21 = arith.constant 0 : index
    %c3 = arith.constant 3 : index
    %73 = memref.load %arg3[%c0_21, %c3] : memref<8x9xf32, #tpu.memory_space<smem>>
    %74 = vector.broadcast %73 : f32 to vector<8x256xf32>
    %75 = arith.mulf %33, %74 : vector<8x256xf32>
    %76 = arith.addf %72, %75 : vector<8x256xf32>
    %c0_22 = arith.constant 0 : index
    %c4 = arith.constant 4 : index
    %77 = memref.load %arg3[%c0_22, %c4] : memref<8x9xf32, #tpu.memory_space<smem>>
    %78 = vector.broadcast %77 : f32 to vector<8x256xf32>
    %79 = arith.mulf %0, %78 : vector<8x256xf32>
    %80 = arith.addf %76, %79 : vector<8x256xf32>
    %c0_23 = arith.constant 0 : index
    %c5 = arith.constant 5 : index
    %81 = memref.load %arg3[%c0_23, %c5] : memref<8x9xf32, #tpu.memory_space<smem>>
    %82 = vector.broadcast %81 : f32 to vector<8x256xf32>
    %83 = arith.mulf %38, %82 : vector<8x256xf32>
    %84 = arith.addf %80, %83 : vector<8x256xf32>
    %c0_24 = arith.constant 0 : index
    %c6 = arith.constant 6 : index
    %85 = memref.load %arg3[%c0_24, %c6] : memref<8x9xf32, #tpu.memory_space<smem>>
    %86 = vector.broadcast %85 : f32 to vector<8x256xf32>
    %87 = arith.mulf %44, %86 : vector<8x256xf32>
    %88 = arith.addf %84, %87 : vector<8x256xf32>
    %c0_25 = arith.constant 0 : index
    %c7 = arith.constant 7 : index
    %89 = memref.load %arg3[%c0_25, %c7] : memref<8x9xf32, #tpu.memory_space<smem>>
    %90 = vector.broadcast %89 : f32 to vector<8x256xf32>
    %91 = arith.mulf %49, %90 : vector<8x256xf32>
    %92 = arith.addf %88, %91 : vector<8x256xf32>
    %c0_26 = arith.constant 0 : index
    %c8 = arith.constant 8 : index
    %93 = memref.load %arg3[%c0_26, %c8] : memref<8x9xf32, #tpu.memory_space<smem>>
    %94 = vector.broadcast %93 : f32 to vector<8x256xf32>
    %95 = arith.mulf %55, %94 : vector<8x256xf32>
    %96 = arith.addf %92, %95 : vector<8x256xf32>
    %c0_27 = arith.constant 0 : index
    %c0_28 = arith.constant 0 : index
    %97 = memref.load %arg4[%c0_27, %c0_28] : memref<8x1xf32, #tpu.memory_space<smem>>
    %98 = vector.broadcast %97 : f32 to vector<8x256xf32>
    %99 = arith.addf %96, %98 : vector<8x256xf32>
    %cst_29 = arith.constant 0.000000e+00 : f32
    %100 = vector.broadcast %cst_29 : f32 to vector<8x256xf32>
    %101 = arith.maximumf %99, %100 : vector<8x256xf32>
    %cst_30 = arith.constant dense<0.000000e+00> : vector<8xf32>
    %102 = vector.multi_reduction <add>, %101, %cst_30 [1] : vector<8x256xf32> to vector<8xf32>
    %103 = vector.shape_cast %102 : vector<8xf32> to vector<8x1xf32>
    %cst_31 = arith.constant 3.906250e-03 : f32
    %104 = vector.broadcast %cst_31 : f32 to vector<8x1xf32>
    %105 = arith.mulf %103, %104 : vector<8x1xf32>
    %c0_32 = arith.constant 0 : index
    %c0_33 = arith.constant 0 : index
    %106 = vector.load %arg5[%c0_32, %c0_33] : memref<8x4xf32, #tpu.memory_space<vmem>>, vector<1x4xf32>
    %107 = vector.broadcast %105 : vector<8x1xf32> to vector<8x4xf32>
    %108 = vector.broadcast %106 : vector<1x4xf32> to vector<8x4xf32>
    %109 = arith.mulf %107, %108 : vector<8x4xf32>
    %110 = arith.addf %59, %109 : vector<8x4xf32>
    %cst_34 = arith.constant 0.000000e+00 : f32
    %111 = vector.broadcast %cst_34 : f32 to vector<8x256xf32>
    %c1_35 = arith.constant 1 : index
    %c0_36 = arith.constant 0 : index
    %112 = memref.load %arg3[%c1_35, %c0_36] : memref<8x9xf32, #tpu.memory_space<smem>>
    %113 = vector.broadcast %112 : f32 to vector<8x256xf32>
    %114 = arith.mulf %17, %113 : vector<8x256xf32>
    %115 = arith.addf %111, %114 : vector<8x256xf32>
    %c1_37 = arith.constant 1 : index
    %c1_38 = arith.constant 1 : index
    %116 = memref.load %arg3[%c1_37, %c1_38] : memref<8x9xf32, #tpu.memory_space<smem>>
    %117 = vector.broadcast %116 : f32 to vector<8x256xf32>
    %118 = arith.mulf %22, %117 : vector<8x256xf32>
    %119 = arith.addf %115, %118 : vector<8x256xf32>
    %c1_39 = arith.constant 1 : index
    %c2_40 = arith.constant 2 : index
    %120 = memref.load %arg3[%c1_39, %c2_40] : memref<8x9xf32, #tpu.memory_space<smem>>
    %121 = vector.broadcast %120 : f32 to vector<8x256xf32>
    %122 = arith.mulf %28, %121 : vector<8x256xf32>
    %123 = arith.addf %119, %122 : vector<8x256xf32>
    %c1_41 = arith.constant 1 : index
    %c3_42 = arith.constant 3 : index
    %124 = memref.load %arg3[%c1_41, %c3_42] : memref<8x9xf32, #tpu.memory_space<smem>>
    %125 = vector.broadcast %124 : f32 to vector<8x256xf32>
    %126 = arith.mulf %33, %125 : vector<8x256xf32>
    %127 = arith.addf %123, %126 : vector<8x256xf32>
    %c1_43 = arith.constant 1 : index
    %c4_44 = arith.constant 4 : index
    %128 = memref.load %arg3[%c1_43, %c4_44] : memref<8x9xf32, #tpu.memory_space<smem>>
    %129 = vector.broadcast %128 : f32 to vector<8x256xf32>
    %130 = arith.mulf %0, %129 : vector<8x256xf32>
    %131 = arith.addf %127, %130 : vector<8x256xf32>
    %c1_45 = arith.constant 1 : index
    %c5_46 = arith.constant 5 : index
    %132 = memref.load %arg3[%c1_45, %c5_46] : memref<8x9xf32, #tpu.memory_space<smem>>
    %133 = vector.broadcast %132 : f32 to vector<8x256xf32>
    %134 = arith.mulf %38, %133 : vector<8x256xf32>
    %135 = arith.addf %131, %134 : vector<8x256xf32>
    %c1_47 = arith.constant 1 : index
    %c6_48 = arith.constant 6 : index
    %136 = memref.load %arg3[%c1_47, %c6_48] : memref<8x9xf32, #tpu.memory_space<smem>>
    %137 = vector.broadcast %136 : f32 to vector<8x256xf32>
    %138 = arith.mulf %44, %137 : vector<8x256xf32>
    %139 = arith.addf %135, %138 : vector<8x256xf32>
    %c1_49 = arith.constant 1 : index
    %c7_50 = arith.constant 7 : index
    %140 = memref.load %arg3[%c1_49, %c7_50] : memref<8x9xf32, #tpu.memory_space<smem>>
    %141 = vector.broadcast %140 : f32 to vector<8x256xf32>
    %142 = arith.mulf %49, %141 : vector<8x256xf32>
    %143 = arith.addf %139, %142 : vector<8x256xf32>
    %c1_51 = arith.constant 1 : index
    %c8_52 = arith.constant 8 : index
    %144 = memref.load %arg3[%c1_51, %c8_52] : memref<8x9xf32, #tpu.memory_space<smem>>
    %145 = vector.broadcast %144 : f32 to vector<8x256xf32>
    %146 = arith.mulf %55, %145 : vector<8x256xf32>
    %147 = arith.addf %143, %146 : vector<8x256xf32>
    %c1_53 = arith.constant 1 : index
    %c0_54 = arith.constant 0 : index
    %148 = memref.load %arg4[%c1_53, %c0_54] : memref<8x1xf32, #tpu.memory_space<smem>>
    %149 = vector.broadcast %148 : f32 to vector<8x256xf32>
    %150 = arith.addf %147, %149 : vector<8x256xf32>
    %cst_55 = arith.constant 0.000000e+00 : f32
    %151 = vector.broadcast %cst_55 : f32 to vector<8x256xf32>
    %152 = arith.maximumf %150, %151 : vector<8x256xf32>
    %cst_56 = arith.constant dense<0.000000e+00> : vector<8xf32>
    %153 = vector.multi_reduction <add>, %152, %cst_56 [1] : vector<8x256xf32> to vector<8xf32>
    %154 = vector.shape_cast %153 : vector<8xf32> to vector<8x1xf32>
    %cst_57 = arith.constant 3.906250e-03 : f32
    %155 = vector.broadcast %cst_57 : f32 to vector<8x1xf32>
    %156 = arith.mulf %154, %155 : vector<8x1xf32>
    %c1_58 = arith.constant 1 : index
    %c0_59 = arith.constant 0 : index
    %157 = vector.load %arg5[%c1_58, %c0_59] : memref<8x4xf32, #tpu.memory_space<vmem>>, vector<1x4xf32>
    %158 = vector.broadcast %156 : vector<8x1xf32> to vector<8x4xf32>
    %159 = vector.broadcast %157 : vector<1x4xf32> to vector<8x4xf32>
    %160 = arith.mulf %158, %159 : vector<8x4xf32>
    %161 = arith.addf %110, %160 : vector<8x4xf32>
    %cst_60 = arith.constant 0.000000e+00 : f32
    %162 = vector.broadcast %cst_60 : f32 to vector<8x256xf32>
    %c2_61 = arith.constant 2 : index
    %c0_62 = arith.constant 0 : index
    %163 = memref.load %arg3[%c2_61, %c0_62] : memref<8x9xf32, #tpu.memory_space<smem>>
    %164 = vector.broadcast %163 : f32 to vector<8x256xf32>
    %165 = arith.mulf %17, %164 : vector<8x256xf32>
    %166 = arith.addf %162, %165 : vector<8x256xf32>
    %c2_63 = arith.constant 2 : index
    %c1_64 = arith.constant 1 : index
    %167 = memref.load %arg3[%c2_63, %c1_64] : memref<8x9xf32, #tpu.memory_space<smem>>
    %168 = vector.broadcast %167 : f32 to vector<8x256xf32>
    %169 = arith.mulf %22, %168 : vector<8x256xf32>
    %170 = arith.addf %166, %169 : vector<8x256xf32>
    %c2_65 = arith.constant 2 : index
    %c2_66 = arith.constant 2 : index
    %171 = memref.load %arg3[%c2_65, %c2_66] : memref<8x9xf32, #tpu.memory_space<smem>>
    %172 = vector.broadcast %171 : f32 to vector<8x256xf32>
    %173 = arith.mulf %28, %172 : vector<8x256xf32>
    %174 = arith.addf %170, %173 : vector<8x256xf32>
    %c2_67 = arith.constant 2 : index
    %c3_68 = arith.constant 3 : index
    %175 = memref.load %arg3[%c2_67, %c3_68] : memref<8x9xf32, #tpu.memory_space<smem>>
    %176 = vector.broadcast %175 : f32 to vector<8x256xf32>
    %177 = arith.mulf %33, %176 : vector<8x256xf32>
    %178 = arith.addf %174, %177 : vector<8x256xf32>
    %c2_69 = arith.constant 2 : index
    %c4_70 = arith.constant 4 : index
    %179 = memref.load %arg3[%c2_69, %c4_70] : memref<8x9xf32, #tpu.memory_space<smem>>
    %180 = vector.broadcast %179 : f32 to vector<8x256xf32>
    %181 = arith.mulf %0, %180 : vector<8x256xf32>
    %182 = arith.addf %178, %181 : vector<8x256xf32>
    %c2_71 = arith.constant 2 : index
    %c5_72 = arith.constant 5 : index
    %183 = memref.load %arg3[%c2_71, %c5_72] : memref<8x9xf32, #tpu.memory_space<smem>>
    %184 = vector.broadcast %183 : f32 to vector<8x256xf32>
    %185 = arith.mulf %38, %184 : vector<8x256xf32>
    %186 = arith.addf %182, %185 : vector<8x256xf32>
    %c2_73 = arith.constant 2 : index
    %c6_74 = arith.constant 6 : index
    %187 = memref.load %arg3[%c2_73, %c6_74] : memref<8x9xf32, #tpu.memory_space<smem>>
    %188 = vector.broadcast %187 : f32 to vector<8x256xf32>
    %189 = arith.mulf %44, %188 : vector<8x256xf32>
    %190 = arith.addf %186, %189 : vector<8x256xf32>
    %c2_75 = arith.constant 2 : index
    %c7_76 = arith.constant 7 : index
    %191 = memref.load %arg3[%c2_75, %c7_76] : memref<8x9xf32, #tpu.memory_space<smem>>
    %192 = vector.broadcast %191 : f32 to vector<8x256xf32>
    %193 = arith.mulf %49, %192 : vector<8x256xf32>
    %194 = arith.addf %190, %193 : vector<8x256xf32>
    %c2_77 = arith.constant 2 : index
    %c8_78 = arith.constant 8 : index
    %195 = memref.load %arg3[%c2_77, %c8_78] : memref<8x9xf32, #tpu.memory_space<smem>>
    %196 = vector.broadcast %195 : f32 to vector<8x256xf32>
    %197 = arith.mulf %55, %196 : vector<8x256xf32>
    %198 = arith.addf %194, %197 : vector<8x256xf32>
    %c2_79 = arith.constant 2 : index
    %c0_80 = arith.constant 0 : index
    %199 = memref.load %arg4[%c2_79, %c0_80] : memref<8x1xf32, #tpu.memory_space<smem>>
    %200 = vector.broadcast %199 : f32 to vector<8x256xf32>
    %201 = arith.addf %198, %200 : vector<8x256xf32>
    %cst_81 = arith.constant 0.000000e+00 : f32
    %202 = vector.broadcast %cst_81 : f32 to vector<8x256xf32>
    %203 = arith.maximumf %201, %202 : vector<8x256xf32>
    %cst_82 = arith.constant dense<0.000000e+00> : vector<8xf32>
    %204 = vector.multi_reduction <add>, %203, %cst_82 [1] : vector<8x256xf32> to vector<8xf32>
    %205 = vector.shape_cast %204 : vector<8xf32> to vector<8x1xf32>
    %cst_83 = arith.constant 3.906250e-03 : f32
    %206 = vector.broadcast %cst_83 : f32 to vector<8x1xf32>
    %207 = arith.mulf %205, %206 : vector<8x1xf32>
    %c2_84 = arith.constant 2 : index
    %c0_85 = arith.constant 0 : index
    %208 = vector.load %arg5[%c2_84, %c0_85] : memref<8x4xf32, #tpu.memory_space<vmem>>, vector<1x4xf32>
    %209 = vector.broadcast %207 : vector<8x1xf32> to vector<8x4xf32>
    %210 = vector.broadcast %208 : vector<1x4xf32> to vector<8x4xf32>
    %211 = arith.mulf %209, %210 : vector<8x4xf32>
    %212 = arith.addf %161, %211 : vector<8x4xf32>
    %cst_86 = arith.constant 0.000000e+00 : f32
    %213 = vector.broadcast %cst_86 : f32 to vector<8x256xf32>
    %c3_87 = arith.constant 3 : index
    %c0_88 = arith.constant 0 : index
    %214 = memref.load %arg3[%c3_87, %c0_88] : memref<8x9xf32, #tpu.memory_space<smem>>
    %215 = vector.broadcast %214 : f32 to vector<8x256xf32>
    %216 = arith.mulf %17, %215 : vector<8x256xf32>
    %217 = arith.addf %213, %216 : vector<8x256xf32>
    %c3_89 = arith.constant 3 : index
    %c1_90 = arith.constant 1 : index
    %218 = memref.load %arg3[%c3_89, %c1_90] : memref<8x9xf32, #tpu.memory_space<smem>>
    %219 = vector.broadcast %218 : f32 to vector<8x256xf32>
    %220 = arith.mulf %22, %219 : vector<8x256xf32>
    %221 = arith.addf %217, %220 : vector<8x256xf32>
    %c3_91 = arith.constant 3 : index
    %c2_92 = arith.constant 2 : index
    %222 = memref.load %arg3[%c3_91, %c2_92] : memref<8x9xf32, #tpu.memory_space<smem>>
    %223 = vector.broadcast %222 : f32 to vector<8x256xf32>
    %224 = arith.mulf %28, %223 : vector<8x256xf32>
    %225 = arith.addf %221, %224 : vector<8x256xf32>
    %c3_93 = arith.constant 3 : index
    %c3_94 = arith.constant 3 : index
    %226 = memref.load %arg3[%c3_93, %c3_94] : memref<8x9xf32, #tpu.memory_space<smem>>
    %227 = vector.broadcast %226 : f32 to vector<8x256xf32>
    %228 = arith.mulf %33, %227 : vector<8x256xf32>
    %229 = arith.addf %225, %228 : vector<8x256xf32>
    %c3_95 = arith.constant 3 : index
    %c4_96 = arith.constant 4 : index
    %230 = memref.load %arg3[%c3_95, %c4_96] : memref<8x9xf32, #tpu.memory_space<smem>>
    %231 = vector.broadcast %230 : f32 to vector<8x256xf32>
    %232 = arith.mulf %0, %231 : vector<8x256xf32>
    %233 = arith.addf %229, %232 : vector<8x256xf32>
    %c3_97 = arith.constant 3 : index
    %c5_98 = arith.constant 5 : index
    %234 = memref.load %arg3[%c3_97, %c5_98] : memref<8x9xf32, #tpu.memory_space<smem>>
    %235 = vector.broadcast %234 : f32 to vector<8x256xf32>
    %236 = arith.mulf %38, %235 : vector<8x256xf32>
    %237 = arith.addf %233, %236 : vector<8x256xf32>
    %c3_99 = arith.constant 3 : index
    %c6_100 = arith.constant 6 : index
    %238 = memref.load %arg3[%c3_99, %c6_100] : memref<8x9xf32, #tpu.memory_space<smem>>
    %239 = vector.broadcast %238 : f32 to vector<8x256xf32>
    %240 = arith.mulf %44, %239 : vector<8x256xf32>
    %241 = arith.addf %237, %240 : vector<8x256xf32>
    %c3_101 = arith.constant 3 : index
    %c7_102 = arith.constant 7 : index
    %242 = memref.load %arg3[%c3_101, %c7_102] : memref<8x9xf32, #tpu.memory_space<smem>>
    %243 = vector.broadcast %242 : f32 to vector<8x256xf32>
    %244 = arith.mulf %49, %243 : vector<8x256xf32>
    %245 = arith.addf %241, %244 : vector<8x256xf32>
    %c3_103 = arith.constant 3 : index
    %c8_104 = arith.constant 8 : index
    %246 = memref.load %arg3[%c3_103, %c8_104] : memref<8x9xf32, #tpu.memory_space<smem>>
    %247 = vector.broadcast %246 : f32 to vector<8x256xf32>
    %248 = arith.mulf %55, %247 : vector<8x256xf32>
    %249 = arith.addf %245, %248 : vector<8x256xf32>
    %c3_105 = arith.constant 3 : index
    %c0_106 = arith.constant 0 : index
    %250 = memref.load %arg4[%c3_105, %c0_106] : memref<8x1xf32, #tpu.memory_space<smem>>
    %251 = vector.broadcast %250 : f32 to vector<8x256xf32>
    %252 = arith.addf %249, %251 : vector<8x256xf32>
    %cst_107 = arith.constant 0.000000e+00 : f32
    %253 = vector.broadcast %cst_107 : f32 to vector<8x256xf32>
    %254 = arith.maximumf %252, %253 : vector<8x256xf32>
    %cst_108 = arith.constant dense<0.000000e+00> : vector<8xf32>
    %255 = vector.multi_reduction <add>, %254, %cst_108 [1] : vector<8x256xf32> to vector<8xf32>
    %256 = vector.shape_cast %255 : vector<8xf32> to vector<8x1xf32>
    %cst_109 = arith.constant 3.906250e-03 : f32
    %257 = vector.broadcast %cst_109 : f32 to vector<8x1xf32>
    %258 = arith.mulf %256, %257 : vector<8x1xf32>
    %c3_110 = arith.constant 3 : index
    %c0_111 = arith.constant 0 : index
    %259 = vector.load %arg5[%c3_110, %c0_111] : memref<8x4xf32, #tpu.memory_space<vmem>>, vector<1x4xf32>
    %260 = vector.broadcast %258 : vector<8x1xf32> to vector<8x4xf32>
    %261 = vector.broadcast %259 : vector<1x4xf32> to vector<8x4xf32>
    %262 = arith.mulf %260, %261 : vector<8x4xf32>
    %263 = arith.addf %212, %262 : vector<8x4xf32>
    %cst_112 = arith.constant 0.000000e+00 : f32
    %264 = vector.broadcast %cst_112 : f32 to vector<8x256xf32>
    %c4_113 = arith.constant 4 : index
    %c0_114 = arith.constant 0 : index
    %265 = memref.load %arg3[%c4_113, %c0_114] : memref<8x9xf32, #tpu.memory_space<smem>>
    %266 = vector.broadcast %265 : f32 to vector<8x256xf32>
    %267 = arith.mulf %17, %266 : vector<8x256xf32>
    %268 = arith.addf %264, %267 : vector<8x256xf32>
    %c4_115 = arith.constant 4 : index
    %c1_116 = arith.constant 1 : index
    %269 = memref.load %arg3[%c4_115, %c1_116] : memref<8x9xf32, #tpu.memory_space<smem>>
    %270 = vector.broadcast %269 : f32 to vector<8x256xf32>
    %271 = arith.mulf %22, %270 : vector<8x256xf32>
    %272 = arith.addf %268, %271 : vector<8x256xf32>
    %c4_117 = arith.constant 4 : index
    %c2_118 = arith.constant 2 : index
    %273 = memref.load %arg3[%c4_117, %c2_118] : memref<8x9xf32, #tpu.memory_space<smem>>
    %274 = vector.broadcast %273 : f32 to vector<8x256xf32>
    %275 = arith.mulf %28, %274 : vector<8x256xf32>
    %276 = arith.addf %272, %275 : vector<8x256xf32>
    %c4_119 = arith.constant 4 : index
    %c3_120 = arith.constant 3 : index
    %277 = memref.load %arg3[%c4_119, %c3_120] : memref<8x9xf32, #tpu.memory_space<smem>>
    %278 = vector.broadcast %277 : f32 to vector<8x256xf32>
    %279 = arith.mulf %33, %278 : vector<8x256xf32>
    %280 = arith.addf %276, %279 : vector<8x256xf32>
    %c4_121 = arith.constant 4 : index
    %c4_122 = arith.constant 4 : index
    %281 = memref.load %arg3[%c4_121, %c4_122] : memref<8x9xf32, #tpu.memory_space<smem>>
    %282 = vector.broadcast %281 : f32 to vector<8x256xf32>
    %283 = arith.mulf %0, %282 : vector<8x256xf32>
    %284 = arith.addf %280, %283 : vector<8x256xf32>
    %c4_123 = arith.constant 4 : index
    %c5_124 = arith.constant 5 : index
    %285 = memref.load %arg3[%c4_123, %c5_124] : memref<8x9xf32, #tpu.memory_space<smem>>
    %286 = vector.broadcast %285 : f32 to vector<8x256xf32>
    %287 = arith.mulf %38, %286 : vector<8x256xf32>
    %288 = arith.addf %284, %287 : vector<8x256xf32>
    %c4_125 = arith.constant 4 : index
    %c6_126 = arith.constant 6 : index
    %289 = memref.load %arg3[%c4_125, %c6_126] : memref<8x9xf32, #tpu.memory_space<smem>>
    %290 = vector.broadcast %289 : f32 to vector<8x256xf32>
    %291 = arith.mulf %44, %290 : vector<8x256xf32>
    %292 = arith.addf %288, %291 : vector<8x256xf32>
    %c4_127 = arith.constant 4 : index
    %c7_128 = arith.constant 7 : index
    %293 = memref.load %arg3[%c4_127, %c7_128] : memref<8x9xf32, #tpu.memory_space<smem>>
    %294 = vector.broadcast %293 : f32 to vector<8x256xf32>
    %295 = arith.mulf %49, %294 : vector<8x256xf32>
    %296 = arith.addf %292, %295 : vector<8x256xf32>
    %c4_129 = arith.constant 4 : index
    %c8_130 = arith.constant 8 : index
    %297 = memref.load %arg3[%c4_129, %c8_130] : memref<8x9xf32, #tpu.memory_space<smem>>
    %298 = vector.broadcast %297 : f32 to vector<8x256xf32>
    %299 = arith.mulf %55, %298 : vector<8x256xf32>
    %300 = arith.addf %296, %299 : vector<8x256xf32>
    %c4_131 = arith.constant 4 : index
    %c0_132 = arith.constant 0 : index
    %301 = memref.load %arg4[%c4_131, %c0_132] : memref<8x1xf32, #tpu.memory_space<smem>>
    %302 = vector.broadcast %301 : f32 to vector<8x256xf32>
    %303 = arith.addf %300, %302 : vector<8x256xf32>
    %cst_133 = arith.constant 0.000000e+00 : f32
    %304 = vector.broadcast %cst_133 : f32 to vector<8x256xf32>
    %305 = arith.maximumf %303, %304 : vector<8x256xf32>
    %cst_134 = arith.constant dense<0.000000e+00> : vector<8xf32>
    %306 = vector.multi_reduction <add>, %305, %cst_134 [1] : vector<8x256xf32> to vector<8xf32>
    %307 = vector.shape_cast %306 : vector<8xf32> to vector<8x1xf32>
    %cst_135 = arith.constant 3.906250e-03 : f32
    %308 = vector.broadcast %cst_135 : f32 to vector<8x1xf32>
    %309 = arith.mulf %307, %308 : vector<8x1xf32>
    %c4_136 = arith.constant 4 : index
    %c0_137 = arith.constant 0 : index
    %310 = vector.load %arg5[%c4_136, %c0_137] : memref<8x4xf32, #tpu.memory_space<vmem>>, vector<1x4xf32>
    %311 = vector.broadcast %309 : vector<8x1xf32> to vector<8x4xf32>
    %312 = vector.broadcast %310 : vector<1x4xf32> to vector<8x4xf32>
    %313 = arith.mulf %311, %312 : vector<8x4xf32>
    %314 = arith.addf %263, %313 : vector<8x4xf32>
    %cst_138 = arith.constant 0.000000e+00 : f32
    %315 = vector.broadcast %cst_138 : f32 to vector<8x256xf32>
    %c5_139 = arith.constant 5 : index
    %c0_140 = arith.constant 0 : index
    %316 = memref.load %arg3[%c5_139, %c0_140] : memref<8x9xf32, #tpu.memory_space<smem>>
    %317 = vector.broadcast %316 : f32 to vector<8x256xf32>
    %318 = arith.mulf %17, %317 : vector<8x256xf32>
    %319 = arith.addf %315, %318 : vector<8x256xf32>
    %c5_141 = arith.constant 5 : index
    %c1_142 = arith.constant 1 : index
    %320 = memref.load %arg3[%c5_141, %c1_142] : memref<8x9xf32, #tpu.memory_space<smem>>
    %321 = vector.broadcast %320 : f32 to vector<8x256xf32>
    %322 = arith.mulf %22, %321 : vector<8x256xf32>
    %323 = arith.addf %319, %322 : vector<8x256xf32>
    %c5_143 = arith.constant 5 : index
    %c2_144 = arith.constant 2 : index
    %324 = memref.load %arg3[%c5_143, %c2_144] : memref<8x9xf32, #tpu.memory_space<smem>>
    %325 = vector.broadcast %324 : f32 to vector<8x256xf32>
    %326 = arith.mulf %28, %325 : vector<8x256xf32>
    %327 = arith.addf %323, %326 : vector<8x256xf32>
    %c5_145 = arith.constant 5 : index
    %c3_146 = arith.constant 3 : index
    %328 = memref.load %arg3[%c5_145, %c3_146] : memref<8x9xf32, #tpu.memory_space<smem>>
    %329 = vector.broadcast %328 : f32 to vector<8x256xf32>
    %330 = arith.mulf %33, %329 : vector<8x256xf32>
    %331 = arith.addf %327, %330 : vector<8x256xf32>
    %c5_147 = arith.constant 5 : index
    %c4_148 = arith.constant 4 : index
    %332 = memref.load %arg3[%c5_147, %c4_148] : memref<8x9xf32, #tpu.memory_space<smem>>
    %333 = vector.broadcast %332 : f32 to vector<8x256xf32>
    %334 = arith.mulf %0, %333 : vector<8x256xf32>
    %335 = arith.addf %331, %334 : vector<8x256xf32>
    %c5_149 = arith.constant 5 : index
    %c5_150 = arith.constant 5 : index
    %336 = memref.load %arg3[%c5_149, %c5_150] : memref<8x9xf32, #tpu.memory_space<smem>>
    %337 = vector.broadcast %336 : f32 to vector<8x256xf32>
    %338 = arith.mulf %38, %337 : vector<8x256xf32>
    %339 = arith.addf %335, %338 : vector<8x256xf32>
    %c5_151 = arith.constant 5 : index
    %c6_152 = arith.constant 6 : index
    %340 = memref.load %arg3[%c5_151, %c6_152] : memref<8x9xf32, #tpu.memory_space<smem>>
    %341 = vector.broadcast %340 : f32 to vector<8x256xf32>
    %342 = arith.mulf %44, %341 : vector<8x256xf32>
    %343 = arith.addf %339, %342 : vector<8x256xf32>
    %c5_153 = arith.constant 5 : index
    %c7_154 = arith.constant 7 : index
    %344 = memref.load %arg3[%c5_153, %c7_154] : memref<8x9xf32, #tpu.memory_space<smem>>
    %345 = vector.broadcast %344 : f32 to vector<8x256xf32>
    %346 = arith.mulf %49, %345 : vector<8x256xf32>
    %347 = arith.addf %343, %346 : vector<8x256xf32>
    %c5_155 = arith.constant 5 : index
    %c8_156 = arith.constant 8 : index
    %348 = memref.load %arg3[%c5_155, %c8_156] : memref<8x9xf32, #tpu.memory_space<smem>>
    %349 = vector.broadcast %348 : f32 to vector<8x256xf32>
    %350 = arith.mulf %55, %349 : vector<8x256xf32>
    %351 = arith.addf %347, %350 : vector<8x256xf32>
    %c5_157 = arith.constant 5 : index
    %c0_158 = arith.constant 0 : index
    %352 = memref.load %arg4[%c5_157, %c0_158] : memref<8x1xf32, #tpu.memory_space<smem>>
    %353 = vector.broadcast %352 : f32 to vector<8x256xf32>
    %354 = arith.addf %351, %353 : vector<8x256xf32>
    %cst_159 = arith.constant 0.000000e+00 : f32
    %355 = vector.broadcast %cst_159 : f32 to vector<8x256xf32>
    %356 = arith.maximumf %354, %355 : vector<8x256xf32>
    %cst_160 = arith.constant dense<0.000000e+00> : vector<8xf32>
    %357 = vector.multi_reduction <add>, %356, %cst_160 [1] : vector<8x256xf32> to vector<8xf32>
    %358 = vector.shape_cast %357 : vector<8xf32> to vector<8x1xf32>
    %cst_161 = arith.constant 3.906250e-03 : f32
    %359 = vector.broadcast %cst_161 : f32 to vector<8x1xf32>
    %360 = arith.mulf %358, %359 : vector<8x1xf32>
    %c5_162 = arith.constant 5 : index
    %c0_163 = arith.constant 0 : index
    %361 = vector.load %arg5[%c5_162, %c0_163] : memref<8x4xf32, #tpu.memory_space<vmem>>, vector<1x4xf32>
    %362 = vector.broadcast %360 : vector<8x1xf32> to vector<8x4xf32>
    %363 = vector.broadcast %361 : vector<1x4xf32> to vector<8x4xf32>
    %364 = arith.mulf %362, %363 : vector<8x4xf32>
    %365 = arith.addf %314, %364 : vector<8x4xf32>
    %cst_164 = arith.constant 0.000000e+00 : f32
    %366 = vector.broadcast %cst_164 : f32 to vector<8x256xf32>
    %c6_165 = arith.constant 6 : index
    %c0_166 = arith.constant 0 : index
    %367 = memref.load %arg3[%c6_165, %c0_166] : memref<8x9xf32, #tpu.memory_space<smem>>
    %368 = vector.broadcast %367 : f32 to vector<8x256xf32>
    %369 = arith.mulf %17, %368 : vector<8x256xf32>
    %370 = arith.addf %366, %369 : vector<8x256xf32>
    %c6_167 = arith.constant 6 : index
    %c1_168 = arith.constant 1 : index
    %371 = memref.load %arg3[%c6_167, %c1_168] : memref<8x9xf32, #tpu.memory_space<smem>>
    %372 = vector.broadcast %371 : f32 to vector<8x256xf32>
    %373 = arith.mulf %22, %372 : vector<8x256xf32>
    %374 = arith.addf %370, %373 : vector<8x256xf32>
    %c6_169 = arith.constant 6 : index
    %c2_170 = arith.constant 2 : index
    %375 = memref.load %arg3[%c6_169, %c2_170] : memref<8x9xf32, #tpu.memory_space<smem>>
    %376 = vector.broadcast %375 : f32 to vector<8x256xf32>
    %377 = arith.mulf %28, %376 : vector<8x256xf32>
    %378 = arith.addf %374, %377 : vector<8x256xf32>
    %c6_171 = arith.constant 6 : index
    %c3_172 = arith.constant 3 : index
    %379 = memref.load %arg3[%c6_171, %c3_172] : memref<8x9xf32, #tpu.memory_space<smem>>
    %380 = vector.broadcast %379 : f32 to vector<8x256xf32>
    %381 = arith.mulf %33, %380 : vector<8x256xf32>
    %382 = arith.addf %378, %381 : vector<8x256xf32>
    %c6_173 = arith.constant 6 : index
    %c4_174 = arith.constant 4 : index
    %383 = memref.load %arg3[%c6_173, %c4_174] : memref<8x9xf32, #tpu.memory_space<smem>>
    %384 = vector.broadcast %383 : f32 to vector<8x256xf32>
    %385 = arith.mulf %0, %384 : vector<8x256xf32>
    %386 = arith.addf %382, %385 : vector<8x256xf32>
    %c6_175 = arith.constant 6 : index
    %c5_176 = arith.constant 5 : index
    %387 = memref.load %arg3[%c6_175, %c5_176] : memref<8x9xf32, #tpu.memory_space<smem>>
    %388 = vector.broadcast %387 : f32 to vector<8x256xf32>
    %389 = arith.mulf %38, %388 : vector<8x256xf32>
    %390 = arith.addf %386, %389 : vector<8x256xf32>
    %c6_177 = arith.constant 6 : index
    %c6_178 = arith.constant 6 : index
    %391 = memref.load %arg3[%c6_177, %c6_178] : memref<8x9xf32, #tpu.memory_space<smem>>
    %392 = vector.broadcast %391 : f32 to vector<8x256xf32>
    %393 = arith.mulf %44, %392 : vector<8x256xf32>
    %394 = arith.addf %390, %393 : vector<8x256xf32>
    %c6_179 = arith.constant 6 : index
    %c7_180 = arith.constant 7 : index
    %395 = memref.load %arg3[%c6_179, %c7_180] : memref<8x9xf32, #tpu.memory_space<smem>>
    %396 = vector.broadcast %395 : f32 to vector<8x256xf32>
    %397 = arith.mulf %49, %396 : vector<8x256xf32>
    %398 = arith.addf %394, %397 : vector<8x256xf32>
    %c6_181 = arith.constant 6 : index
    %c8_182 = arith.constant 8 : index
    %399 = memref.load %arg3[%c6_181, %c8_182] : memref<8x9xf32, #tpu.memory_space<smem>>
    %400 = vector.broadcast %399 : f32 to vector<8x256xf32>
    %401 = arith.mulf %55, %400 : vector<8x256xf32>
    %402 = arith.addf %398, %401 : vector<8x256xf32>
    %c6_183 = arith.constant 6 : index
    %c0_184 = arith.constant 0 : index
    %403 = memref.load %arg4[%c6_183, %c0_184] : memref<8x1xf32, #tpu.memory_space<smem>>
    %404 = vector.broadcast %403 : f32 to vector<8x256xf32>
    %405 = arith.addf %402, %404 : vector<8x256xf32>
    %cst_185 = arith.constant 0.000000e+00 : f32
    %406 = vector.broadcast %cst_185 : f32 to vector<8x256xf32>
    %407 = arith.maximumf %405, %406 : vector<8x256xf32>
    %cst_186 = arith.constant dense<0.000000e+00> : vector<8xf32>
    %408 = vector.multi_reduction <add>, %407, %cst_186 [1] : vector<8x256xf32> to vector<8xf32>
    %409 = vector.shape_cast %408 : vector<8xf32> to vector<8x1xf32>
    %cst_187 = arith.constant 3.906250e-03 : f32
    %410 = vector.broadcast %cst_187 : f32 to vector<8x1xf32>
    %411 = arith.mulf %409, %410 : vector<8x1xf32>
    %c6_188 = arith.constant 6 : index
    %c0_189 = arith.constant 0 : index
    %412 = vector.load %arg5[%c6_188, %c0_189] : memref<8x4xf32, #tpu.memory_space<vmem>>, vector<1x4xf32>
    %413 = vector.broadcast %411 : vector<8x1xf32> to vector<8x4xf32>
    %414 = vector.broadcast %412 : vector<1x4xf32> to vector<8x4xf32>
    %415 = arith.mulf %413, %414 : vector<8x4xf32>
    %416 = arith.addf %365, %415 : vector<8x4xf32>
    %cst_190 = arith.constant 0.000000e+00 : f32
    %417 = vector.broadcast %cst_190 : f32 to vector<8x256xf32>
    %c7_191 = arith.constant 7 : index
    %c0_192 = arith.constant 0 : index
    %418 = memref.load %arg3[%c7_191, %c0_192] : memref<8x9xf32, #tpu.memory_space<smem>>
    %419 = vector.broadcast %418 : f32 to vector<8x256xf32>
    %420 = arith.mulf %17, %419 : vector<8x256xf32>
    %421 = arith.addf %417, %420 : vector<8x256xf32>
    %c7_193 = arith.constant 7 : index
    %c1_194 = arith.constant 1 : index
    %422 = memref.load %arg3[%c7_193, %c1_194] : memref<8x9xf32, #tpu.memory_space<smem>>
    %423 = vector.broadcast %422 : f32 to vector<8x256xf32>
    %424 = arith.mulf %22, %423 : vector<8x256xf32>
    %425 = arith.addf %421, %424 : vector<8x256xf32>
    %c7_195 = arith.constant 7 : index
    %c2_196 = arith.constant 2 : index
    %426 = memref.load %arg3[%c7_195, %c2_196] : memref<8x9xf32, #tpu.memory_space<smem>>
    %427 = vector.broadcast %426 : f32 to vector<8x256xf32>
    %428 = arith.mulf %28, %427 : vector<8x256xf32>
    %429 = arith.addf %425, %428 : vector<8x256xf32>
    %c7_197 = arith.constant 7 : index
    %c3_198 = arith.constant 3 : index
    %430 = memref.load %arg3[%c7_197, %c3_198] : memref<8x9xf32, #tpu.memory_space<smem>>
    %431 = vector.broadcast %430 : f32 to vector<8x256xf32>
    %432 = arith.mulf %33, %431 : vector<8x256xf32>
    %433 = arith.addf %429, %432 : vector<8x256xf32>
    %c7_199 = arith.constant 7 : index
    %c4_200 = arith.constant 4 : index
    %434 = memref.load %arg3[%c7_199, %c4_200] : memref<8x9xf32, #tpu.memory_space<smem>>
    %435 = vector.broadcast %434 : f32 to vector<8x256xf32>
    %436 = arith.mulf %0, %435 : vector<8x256xf32>
    %437 = arith.addf %433, %436 : vector<8x256xf32>
    %c7_201 = arith.constant 7 : index
    %c5_202 = arith.constant 5 : index
    %438 = memref.load %arg3[%c7_201, %c5_202] : memref<8x9xf32, #tpu.memory_space<smem>>
    %439 = vector.broadcast %438 : f32 to vector<8x256xf32>
    %440 = arith.mulf %38, %439 : vector<8x256xf32>
    %441 = arith.addf %437, %440 : vector<8x256xf32>
    %c7_203 = arith.constant 7 : index
    %c6_204 = arith.constant 6 : index
    %442 = memref.load %arg3[%c7_203, %c6_204] : memref<8x9xf32, #tpu.memory_space<smem>>
    %443 = vector.broadcast %442 : f32 to vector<8x256xf32>
    %444 = arith.mulf %44, %443 : vector<8x256xf32>
    %445 = arith.addf %441, %444 : vector<8x256xf32>
    %c7_205 = arith.constant 7 : index
    %c7_206 = arith.constant 7 : index
    %446 = memref.load %arg3[%c7_205, %c7_206] : memref<8x9xf32, #tpu.memory_space<smem>>
    %447 = vector.broadcast %446 : f32 to vector<8x256xf32>
    %448 = arith.mulf %49, %447 : vector<8x256xf32>
    %449 = arith.addf %445, %448 : vector<8x256xf32>
    %c7_207 = arith.constant 7 : index
    %c8_208 = arith.constant 8 : index
    %450 = memref.load %arg3[%c7_207, %c8_208] : memref<8x9xf32, #tpu.memory_space<smem>>
    %451 = vector.broadcast %450 : f32 to vector<8x256xf32>
    %452 = arith.mulf %55, %451 : vector<8x256xf32>
    %453 = arith.addf %449, %452 : vector<8x256xf32>
    %c7_209 = arith.constant 7 : index
    %c0_210 = arith.constant 0 : index
    %454 = memref.load %arg4[%c7_209, %c0_210] : memref<8x1xf32, #tpu.memory_space<smem>>
    %455 = vector.broadcast %454 : f32 to vector<8x256xf32>
    %456 = arith.addf %453, %455 : vector<8x256xf32>
    %cst_211 = arith.constant 0.000000e+00 : f32
    %457 = vector.broadcast %cst_211 : f32 to vector<8x256xf32>
    %458 = arith.maximumf %456, %457 : vector<8x256xf32>
    %cst_212 = arith.constant dense<0.000000e+00> : vector<8xf32>
    %459 = vector.multi_reduction <add>, %458, %cst_212 [1] : vector<8x256xf32> to vector<8xf32>
    %460 = vector.shape_cast %459 : vector<8xf32> to vector<8x1xf32>
    %cst_213 = arith.constant 3.906250e-03 : f32
    %461 = vector.broadcast %cst_213 : f32 to vector<8x1xf32>
    %462 = arith.mulf %460, %461 : vector<8x1xf32>
    %c7_214 = arith.constant 7 : index
    %c0_215 = arith.constant 0 : index
    %463 = vector.load %arg5[%c7_214, %c0_215] : memref<8x4xf32, #tpu.memory_space<vmem>>, vector<1x4xf32>
    %464 = vector.broadcast %462 : vector<8x1xf32> to vector<8x4xf32>
    %465 = vector.broadcast %463 : vector<1x4xf32> to vector<8x4xf32>
    %466 = arith.mulf %464, %465 : vector<8x4xf32>
    %467 = arith.addf %416, %466 : vector<8x4xf32>
    %468 = math.tanh %467 : vector<8x4xf32>
    %cst_216 = arith.constant 0.000000e+00 : f32
    %469 = vector.broadcast %cst_216 : f32 to vector<8x9xf32>
    %c0_217 = arith.constant 0 : index
    %c0_218 = arith.constant 0 : index
    %470 = vector.load %arg8[%c0_217, %c0_218] : memref<1x9xf32, #tpu.memory_space<vmem>>, vector<1x9xf32>
    %471 = vector.broadcast %470 : vector<1x9xf32> to vector<8x9xf32>
    %472 = arith.addf %469, %471 : vector<8x9xf32>
    %473 = vector.extract_strided_slice %468 {offsets = [0, 0], sizes = [8, 1], strides = [1, 1]} : vector<8x4xf32> to vector<8x1xf32>
    %c0_219 = arith.constant 0 : index
    %c0_220 = arith.constant 0 : index
    %474 = vector.load %arg7[%c0_219, %c0_220] : memref<4x9xf32, #tpu.memory_space<vmem>>, vector<1x9xf32>
    %475 = vector.broadcast %473 : vector<8x1xf32> to vector<8x9xf32>
    %476 = vector.broadcast %474 : vector<1x9xf32> to vector<8x9xf32>
    %477 = arith.mulf %475, %476 : vector<8x9xf32>
    %478 = arith.addf %472, %477 : vector<8x9xf32>
    %479 = vector.extract_strided_slice %468 {offsets = [0, 1], sizes = [8, 1], strides = [1, 1]} : vector<8x4xf32> to vector<8x1xf32>
    %c1_221 = arith.constant 1 : index
    %c0_222 = arith.constant 0 : index
    %480 = vector.load %arg7[%c1_221, %c0_222] : memref<4x9xf32, #tpu.memory_space<vmem>>, vector<1x9xf32>
    %481 = vector.broadcast %479 : vector<8x1xf32> to vector<8x9xf32>
    %482 = vector.broadcast %480 : vector<1x9xf32> to vector<8x9xf32>
    %483 = arith.mulf %481, %482 : vector<8x9xf32>
    %484 = arith.addf %478, %483 : vector<8x9xf32>
    %485 = vector.extract_strided_slice %468 {offsets = [0, 2], sizes = [8, 1], strides = [1, 1]} : vector<8x4xf32> to vector<8x1xf32>
    %c2_223 = arith.constant 2 : index
    %c0_224 = arith.constant 0 : index
    %486 = vector.load %arg7[%c2_223, %c0_224] : memref<4x9xf32, #tpu.memory_space<vmem>>, vector<1x9xf32>
    %487 = vector.broadcast %485 : vector<8x1xf32> to vector<8x9xf32>
    %488 = vector.broadcast %486 : vector<1x9xf32> to vector<8x9xf32>
    %489 = arith.mulf %487, %488 : vector<8x9xf32>
    %490 = arith.addf %484, %489 : vector<8x9xf32>
    %491 = vector.extract_strided_slice %468 {offsets = [0, 3], sizes = [8, 1], strides = [1, 1]} : vector<8x4xf32> to vector<8x1xf32>
    %c3_225 = arith.constant 3 : index
    %c0_226 = arith.constant 0 : index
    %492 = vector.load %arg7[%c3_225, %c0_226] : memref<4x9xf32, #tpu.memory_space<vmem>>, vector<1x9xf32>
    %493 = vector.broadcast %491 : vector<8x1xf32> to vector<8x9xf32>
    %494 = vector.broadcast %492 : vector<1x9xf32> to vector<8x9xf32>
    %495 = arith.mulf %493, %494 : vector<8x9xf32>
    %496 = arith.addf %490, %495 : vector<8x9xf32>
    %c0_227 = arith.constant 0 : index
    %c0_228 = arith.constant 0 : index
    %497 = vector.load %arg2[%c0_227, %c0_228] : memref<8x384xf32, #tpu.memory_space<vmem>>, vector<8x384xf32>
    %cst_229 = arith.constant 0.000000e+00 : f32
    %498 = vector.broadcast %cst_229 : f32 to vector<8x384xf32>
    %c4_i32 = arith.constant 4 : i32
    %499 = tpu.dynamic_rotate %497 by %c4_i32 dim 1 : vector<8x384xf32>, i32 -> vector<8x384xf32>
    %500 = vector.extract_strided_slice %496 {offsets = [0, 0], sizes = [8, 1], strides = [1, 1]} : vector<8x9xf32> to vector<8x1xf32>
    %501 = vector.broadcast %500 : vector<8x1xf32> to vector<8x384xf32>
    %502 = arith.mulf %499, %501 : vector<8x384xf32>
    %503 = arith.addf %498, %502 : vector<8x384xf32>
    %c3_i32 = arith.constant 3 : i32
    %504 = tpu.dynamic_rotate %497 by %c3_i32 dim 1 : vector<8x384xf32>, i32 -> vector<8x384xf32>
    %505 = vector.extract_strided_slice %496 {offsets = [0, 1], sizes = [8, 1], strides = [1, 1]} : vector<8x9xf32> to vector<8x1xf32>
    %506 = vector.broadcast %505 : vector<8x1xf32> to vector<8x384xf32>
    %507 = arith.mulf %504, %506 : vector<8x384xf32>
    %508 = arith.addf %503, %507 : vector<8x384xf32>
    %c2_i32 = arith.constant 2 : i32
    %509 = tpu.dynamic_rotate %497 by %c2_i32 dim 1 : vector<8x384xf32>, i32 -> vector<8x384xf32>
    %510 = vector.extract_strided_slice %496 {offsets = [0, 2], sizes = [8, 1], strides = [1, 1]} : vector<8x9xf32> to vector<8x1xf32>
    %511 = vector.broadcast %510 : vector<8x1xf32> to vector<8x384xf32>
    %512 = arith.mulf %509, %511 : vector<8x384xf32>
    %513 = arith.addf %508, %512 : vector<8x384xf32>
    %c1_i32_230 = arith.constant 1 : i32
    %514 = tpu.dynamic_rotate %497 by %c1_i32_230 dim 1 : vector<8x384xf32>, i32 -> vector<8x384xf32>
    %515 = vector.extract_strided_slice %496 {offsets = [0, 3], sizes = [8, 1], strides = [1, 1]} : vector<8x9xf32> to vector<8x1xf32>
    %516 = vector.broadcast %515 : vector<8x1xf32> to vector<8x384xf32>
    %517 = arith.mulf %514, %516 : vector<8x384xf32>
    %518 = arith.addf %513, %517 : vector<8x384xf32>
    %519 = vector.extract_strided_slice %496 {offsets = [0, 4], sizes = [8, 1], strides = [1, 1]} : vector<8x9xf32> to vector<8x1xf32>
    %520 = vector.broadcast %519 : vector<8x1xf32> to vector<8x384xf32>
    %521 = arith.mulf %497, %520 : vector<8x384xf32>
    %522 = arith.addf %518, %521 : vector<8x384xf32>
    %c383_i32 = arith.constant 383 : i32
    %523 = tpu.dynamic_rotate %497 by %c383_i32 dim 1 : vector<8x384xf32>, i32 -> vector<8x384xf32>
    %524 = vector.extract_strided_slice %496 {offsets = [0, 5], sizes = [8, 1], strides = [1, 1]} : vector<8x9xf32> to vector<8x1xf32>
    %525 = vector.broadcast %524 : vector<8x1xf32> to vector<8x384xf32>
    %526 = arith.mulf %523, %525 : vector<8x384xf32>
    %527 = arith.addf %522, %526 : vector<8x384xf32>
    %c382_i32 = arith.constant 382 : i32
    %528 = tpu.dynamic_rotate %497 by %c382_i32 dim 1 : vector<8x384xf32>, i32 -> vector<8x384xf32>
    %529 = vector.extract_strided_slice %496 {offsets = [0, 6], sizes = [8, 1], strides = [1, 1]} : vector<8x9xf32> to vector<8x1xf32>
    %530 = vector.broadcast %529 : vector<8x1xf32> to vector<8x384xf32>
    %531 = arith.mulf %528, %530 : vector<8x384xf32>
    %532 = arith.addf %527, %531 : vector<8x384xf32>
    %c381_i32 = arith.constant 381 : i32
    %533 = tpu.dynamic_rotate %497 by %c381_i32 dim 1 : vector<8x384xf32>, i32 -> vector<8x384xf32>
    %534 = vector.extract_strided_slice %496 {offsets = [0, 7], sizes = [8, 1], strides = [1, 1]} : vector<8x9xf32> to vector<8x1xf32>
    %535 = vector.broadcast %534 : vector<8x1xf32> to vector<8x384xf32>
    %536 = arith.mulf %533, %535 : vector<8x384xf32>
    %537 = arith.addf %532, %536 : vector<8x384xf32>
    %c380_i32 = arith.constant 380 : i32
    %538 = tpu.dynamic_rotate %497 by %c380_i32 dim 1 : vector<8x384xf32>, i32 -> vector<8x384xf32>
    %539 = vector.extract_strided_slice %496 {offsets = [0, 8], sizes = [8, 1], strides = [1, 1]} : vector<8x9xf32> to vector<8x1xf32>
    %540 = vector.broadcast %539 : vector<8x1xf32> to vector<8x384xf32>
    %541 = arith.mulf %538, %540 : vector<8x384xf32>
    %542 = arith.addf %537, %541 : vector<8x384xf32>
    %543 = vector.extract_strided_slice %542 {offsets = [0, 0], sizes = [8, 256], strides = [1, 1]} : vector<8x384xf32> to vector<8x256xf32>
    %c0_231 = arith.constant 0 : index
    %c0_232 = arith.constant 0 : index
    %544 = vector.load %arg9[%c0_231, %c0_232] : memref<8x256xf32, #tpu.memory_space<vmem>>, vector<8x256xf32>
    tpu.vector_store %arg9[%c0_231, %c0_232], %543 {strides = array<i32>} : memref<8x256xf32, #tpu.memory_space<vmem>>, vector<8x256xf32>,
    return
  }
  func.func @transform_0(%arg0: i32) -> (i32, i32) {
    %c0_i32 = arith.constant 0 : i32
    %c0_i32_0 = arith.constant 0 : i32
    return %arg0, %c0_i32 : i32, i32
  }
  func.func @transform_1(%arg0: i32) -> (i32, i32) {
    %c0_i32 = arith.constant 0 : i32
    %c0_i32_0 = arith.constant 0 : i32
    return %arg0, %c0_i32 : i32, i32
  }
  func.func @transform_2(%arg0: i32) -> (i32, i32) {
    %c0_i32 = arith.constant 0 : i32
    %c0_i32_0 = arith.constant 0 : i32
    %c0_i32_1 = arith.constant 0 : i32
    return %c0_i32, %c0_i32_0 : i32, i32
  }
  func.func @transform_3(%arg0: i32) -> (i32, i32) {
    %c0_i32 = arith.constant 0 : i32
    %c0_i32_0 = arith.constant 0 : i32
    %c0_i32_1 = arith.constant 0 : i32
    return %c0_i32, %c0_i32_0 : i32, i32
  }
  func.func @transform_4(%arg0: i32) -> (i32, i32) {
    %c0_i32 = arith.constant 0 : i32
    %c0_i32_0 = arith.constant 0 : i32
    %c0_i32_1 = arith.constant 0 : i32
    return %c0_i32, %c0_i32_0 : i32, i32
  }
  func.func @transform_5(%arg0: i32) -> (i32, i32) {
    %c0_i32 = arith.constant 0 : i32
    %c0_i32_0 = arith.constant 0 : i32
    %c0_i32_1 = arith.constant 0 : i32
    return %c0_i32, %c0_i32_0 : i32, i32
  }
  func.func @transform_6(%arg0: i32) -> (i32, i32) {
    %c0_i32 = arith.constant 0 : i32
    %c0_i32_0 = arith.constant 0 : i32
    %c0_i32_1 = arith.constant 0 : i32
    return %c0_i32, %c0_i32_0 : i32, i32
  }
  func.func @transform_7(%arg0: i32) -> (i32, i32) {
    %c0_i32 = arith.constant 0 : i32
    %c0_i32_0 = arith.constant 0 : i32
    %c0_i32_1 = arith.constant 0 : i32
    return %c0_i32, %c0_i32_0 : i32, i32
  }
  func.func @transform_8(%arg0: i32) -> (i32, i32) {
    %c0_i32 = arith.constant 0 : i32
    %c0_i32_0 = arith.constant 0 : i32
    return %arg0, %c0_i32 : i32, i32
  }
}

</mosaic_0001>

<bundles_post_ra>
// kernel: tpu_custom_call.1
= control target key start
LH: loop header
LB: loop body
LE: loop exit
PB: predicated region body
PF: predicated region fallthrough
CT: control target
= control target key end

     0   :  { %s2974_s0 = inlined_call_operand.hbm [shape: f32[16,256], index: 0, kind: input, shape index: {}]   ;;  %s2975_s1 = inlined_call_operand.hbm [shape: f32[16,384], index: 1, kind: input, shape index: {}]   ;;  %s2976_s2 = inlined_call_operand.vmem [shape: f32[8,9], index: 2, kind: input, shape index: {}]   ;;  %s2977_s3 = inlined_call_operand.vmem [shape: f32[8,1], index: 3, kind: input, shape index: {}]   ;;  %s2978_s4 = inlined_call_operand.vmem [shape: f32[8,4], index: 4, kind: input, shape index: {}]   ;;  %s2979_s5 = inlined_call_operand.vmem [shape: f32[1,4], index: 5, kind: input, shape index: {}]   ;;  %s2980_s6 = inlined_call_operand.vmem [shape: f32[4,9], index: 6, kind: input, shape index: {}]   ;;  %s2981_s7 = inlined_call_operand.vmem [shape: f32[1,9], index: 7, kind: input, shape index: {}]   ;;  %s2982_s8 = inlined_call_operand.hbm [shape: f32[16,256], index: 8, kind: output, shape index: {}]  }
   0x1   :  { %3011 = sst [smem:[#allocation45_spill]] %s2974_s0 }
   0x2   :  { %3012 = sst [smem:[#allocation46_spill]] %s2975_s1 }
   0x3   :  { %3013 = sst [smem:[#allocation47_spill]] %s2976_s2 }
   0x4   :  { %3014 = sst [smem:[#allocation48_spill]] %s2977_s3 }
   0x5   :  { %3015 = sst [smem:[#allocation49_spill]] %s2978_s4 }
   0x6   :  { %3016 = sst [smem:[#allocation50_spill]] %s2979_s5 }
   0x7   :  { %3017 = sst [smem:[#allocation51_spill]] %s2980_s6 }
   0x8   :  { %3018 = sst [smem:[#allocation52_spill]] %s2981_s7 }
   0x9   :  { %3019 = sst [smem:[#allocation53_spill]] %s2982_s8 }
   0xa   :  { %13 = vsyncpa [#allocation3], 0 }
   0xb   :  { %15 = vsyncpa [#allocation3 + $0x1], 0 }
   0xc   :  { %16 = vsyncpa [#allocation7], 0 }
   0xd   :  { %18 = vsyncpa [#allocation7 + $0x1], 0 }
   0xe   :  { %19 = vsyncpa [#allocation5], 0 }
   0xf   :  { %20 = vsyncpa [#allocation10], 0 }
  0x10   :  { %21 = vsyncpa [#allocation4], 0 }
  0x11   :  { %23 = vsyncpa [#allocation4 + $0x1], 0  ;;  %s1855_s27 = smov 0   ;;  %s1857_s28 = smov 0  }
  0x12   :  { %s1859_s29 = smov 0   ;;  %s1861_s30 = smov 0  }
  0x13 LB: > { %3020 = sst [smem:[#allocation17_spill]] %s1771_s27  ;;  %s1876_s9 = sadd.s32 4294967295, %s1783_s30   ;;  %s1783_s30 = sphi %s1861_s30, %s3140_s30   ;;  %s1779_s29 = sphi %s1859_s29, %s3143_s29   ;;  %s1775_s28 = sphi %s1857_s28, %s3142_s28   ;;  %s1771_s27 = sphi %s1855_s27, %s3141_s27  }
  0x14   : > { %3021 = sst [smem:[#allocation18_spill]] %s1775_s28  ;;  %s1386_s10 = sadd.s32 4294967294, %s1783_s30  }
  0x15   : > { %3022 = sst [smem:[#allocation19_spill]] %s1779_s29  ;;  %p49_p0 = scmp.ne.s32.totalorder %s1775_s28, %s1771_s27 }
  0x16   : > { %3023 = sst [smem:[#allocation20_spill]] %s1783_s30  ;;  %p50_p1 = scmp.eq.s32.totalorder %s1876_s9, 0 }
  0x17   : > { %3024 = sst [smem:[#allocation21_spill]] %s1876_s9  ;;  %p225_p2 = scmp.eq.s32.totalorder %s1876_s9, 1 }
  0x18   : > { %p231_p3 = scmp.eq.s32.totalorder %s1386_s10, 1  ;;  %p1885_p4 = por %p50_p1, %p49_p0 }
  0x19   : > { %p1387_p5 = scmp.ge.s32.totalorder %s1783_s30, 1  ;;  %p238_p7 = scmp.lt.s32.totalorder %s1783_s30, 3 }
  0x1a   : > { %p1890_p6 = por %p231_p3, %p49_p0  ;;  %s3028_s2 = sld [smem:[#allocation47_spill]] }
  0x1b   : > { %p1898_p8 = pnand %p1387_p5, %p238_p7  ;;  %s3030_s3 = sld [smem:[#allocation48_spill]] }
  0x1c   : > { %s3026_s12 = scalar_select %p1890_p6, 1, 0 }
  0x1d   : > { %p1502_p10 = pneg %p1898_p8  ;;  %s1911_s20 = sadd.s32 1, %s1783_s30  }
  0x1e   : > { %3027 = sst [smem:[#allocation22_spill]] %s3026_s12  ;;  %s33_s21 = ssub.s32 %s1783_s30, %s1911_s20 }
  0x1f   : > { %p1503_p11 = pnand %p1502_p10, %p50_p1  ;;  %3031 = sst [smem:[#allocation23_spill]] %s1911_s20 }
  0x20   : > { %s250_s15 = sshll.u32 %s3028_s2, 4  ;;  %s1785_s22 = smov [#allocation8]   ;;  %s251_s15 = int_to_ptr.vmem [resolvable:$true] %s250_s15 }
  0x21   : > { %s260_s19 = sshll.u32 %s3030_s3, 4  ;;  %s1786_s23 = smov [#allocation9]   ;;  %s261_s19 = int_to_ptr.vmem [resolvable:$true] %s260_s19 }
  0x22   : > { %1505 = dma.vmem_to_smem (!%p1503_p11), %s251_s15, 128, %s1785_s22, [#allocation5]  }
  0x23   : > { %1508 = dma.vmem_to_smem (!%p1503_p11), %s261_s19, 128, %s1786_s23, [#allocation10]  }
  0x24   : > { %p34_p12 = scmp.eq.s32.totalorder %s33_s21, 0  ;;  %s36_s24 = sadd.s32 1, %s1779_s29 }
  0x25   : > { %p43_p13 = scmp.ne.s32.totalorder %s1779_s29, %s1775_s28  ;;  %p44_p0 = scmp.eq.s32.totalorder %s1783_s30, 0 }
  0x26   : > { %s1920_s25 = scalar_select %p34_p12, %s1779_s29, %s36_s24  }
  0x27   : > { %p45_p3 = por %p44_p0, %p43_p13  ;;  %p1924_p5 = por %p225_p2, %p43_p13 }
  0x28   : > { %3032 = sst [smem:[#allocation24_spill]] %s1920_s25  ;;  %p1522_p7 = scmp.lt.s32.totalorder %s1783_s30, 2 }
  0x29   : > { %s3033_s26 = scalar_select %p1924_p5, 1, 0 }
  0x2a   : > { %s1930_s10 = sand.u32 1, %s1779_s29   ;;  %s1483_s14 = sshll.u32 %s1783_s30, 4 }
  0x2b   : > { %3034 = sst [smem:[#allocation25_spill]] %s3033_s26  ;;  %s1391_s13 = sshll.u32 %s1930_s10, 4 }
  0x2c   : > { %s3035_s0 = sld [smem:[#allocation45_spill]]  ;;  %s287_s19 = scalar_lea.vmem [#allocation2], %s1391_s13 }
  0x2d   : > { %s296_s21 = sshll.u32 %s287_s19, 4  ;;  %p1937_p2 = pnand %p1522_p7, %p45_p3  ;;  %s297_s21 = int_to_ptr.vmem [resolvable:$true] %s296_s21 }
  0x2e   : > { %s1485_s24 = smul.u32 24, %s1930_s10  ;;  %s284_s3 = scalar_lea.sflag [#allocation3], %s1930_s10 }
  0x2f   : > { %s1486_s2 = smul.u32 24, %s1783_s30  ;;  %p1649_p11 = pneg %p1937_p2 }
  0x32   : > { %s292_s18 = scalar_lea.hbm %s3035_s0, %s1483_s14  ;;  %s1652_s15 = scalar_lea.hbm %s3035_s0, 32 }
  0x33   : > { %s294_s22 = sshll.u32 %s292_s18, 4  ;;  %s295_s22 = int_to_ptr.hbm [resolvable:$true] %s294_s22 }
  0x34   : > { %s1645_s25 = sshra.s32 %s295_s22, 4  ;;  %s1646_s25 = int_to_ptr.hbm [resolvable:$true] %s1645_s25 }
  0x35   : > { %s1647_s29 = scalar_lea.hbm %s1646_s25, 16  ;;  %p1653_p0 = scmp.lt.s32.totalorder %s1646_s25, %s3035_s0 }
  0x36   : > { %p1648_p10 = scmp.ne.s32.totalorder %s1646_s25, %s1647_s29  ;;  %p1654_p3 = scmp.lt.s32.totalorder %s1652_s15, %s1647_s29 }
  0x38   : > { %p1650_p12 = pnand %p1649_p11, %p1648_p10  ;;  %p1655_p7 = por %p1654_p3, %p1653_p0 }
  0x3a   : > { %p1651_p13 = pneg %p1650_p12 }
  0x3c   : > { %p1656_p9 = pnand %p1655_p7, %p1651_p13 }
  0x3e   : > { %1659 = shalt.err (!%p1656_p9)
}
  0x3f   : > { %1512 = dma.hbm_to_vmem [thread:$0]  (!%p1937_p2), %s295_s22, 256, %s297_s21, %s284_s3  }
  0x40   : > { %s3037_s1 = sld [smem:[#allocation46_spill]]  ;;  %s307_s13 = scalar_lea.vmem [#allocation6], %s1485_s24 }
  0x41   : > { %s316_s14 = sshll.u32 %s307_s13, 4  ;;  %s304_s17 = scalar_lea.sflag [#allocation7], %s1930_s10  ;;  %s317_s14 = int_to_ptr.vmem [resolvable:$true] %s316_s14 }
  0x46   : > { %s312_s30 = scalar_lea.hbm %s3037_s1, %s1486_s2  ;;  %s1682_s21 = scalar_lea.hbm %s3037_s1, 48 }
  0x47   : > { %s314_s12 = sshll.u32 %s312_s30, 4  ;;  %s315_s12 = int_to_ptr.hbm [resolvable:$true] %s314_s12 }
  0x48   : > { %s1675_s25 = sshra.s32 %s315_s12, 4  ;;  %s1676_s25 = int_to_ptr.hbm [resolvable:$true] %s1675_s25 }
  0x49   : > { %s1677_s29 = scalar_lea.hbm %s1676_s25, 24  ;;  %p1683_p13 = scmp.lt.s32.totalorder %s1676_s25, %s3037_s1 }
  0x4a   : > { %p1678_p10 = scmp.ne.s32.totalorder %s1676_s25, %s1677_s29  ;;  %p1684_p0 = scmp.lt.s32.totalorder %s1682_s21, %s1677_s29 }
  0x4c   : > { %p1680_p9 = pnand %p1678_p10, %p1649_p11  ;;  %p1685_p3 = por %p1684_p0, %p1683_p13 }
  0x4e   : > { %p1681_p12 = pneg %p1680_p9 }
  0x50   : > { %p1686_p7 = pnand %p1685_p3, %p1681_p12 }
  0x52   : > { %1689 = shalt.err (!%p1686_p7)
}
  0x53   : > { %1515 = dma.hbm_to_vmem [thread:$0]  (!%p1937_p2), %s315_s12, 384, %s317_s14, %s304_s17  }
  0x54   : > { %325 = sbr.rel (%p1898_p8) target bundleno = 745 (0x2e9), region = 52 }
  0x59   : > { %s1975_s30 = sand.u32 1, %s1775_s28  }
  0x5a   : > { %3038 = sst [smem:[#allocation26_spill]] %s1975_s30  ;;  %s2988_s10 = sshll.u32 %s1975_s30, 4 }
  0x5b   : > { %s328_s22 = scalar_lea.sflag [#allocation3], %s1975_s30  ;;  %s1981_s24 = scalar_lea.vmem [#allocation2], %s2988_s10 }
  0x5c   : > { %3039 = sst [smem:[#allocation27_spill]] %s1981_s24 }
  0x5d   : > { %1750 = dma.done.wait (%p1885_p4), %s328_s22, 256  }
  0x5e   : > { %1752 = vsyncadd (%p1885_p4), %s328_s22, 4294967040  ;;  %s1487_s12 = smul.u32 24, %s1975_s30  ;;  %s338_s16 = scalar_lea.sflag [#allocation7], %s1975_s30 }
  0x60   : > { %s1989_s23 = scalar_lea.vmem [#allocation6], %s1487_s12 }
  0x61   : > { %3040 = sst [smem:[#allocation28_spill]] %s1989_s23 }
  0x62   : > { %1754 = dma.done.wait (%p1885_p4), %s338_s16, 384  }
  0x63   : > { %1756 = vsyncadd (%p1885_p4), %s338_s16, 4294966912 }
  0x64   : > { %1758 = dma.done.wait (%p50_p1), [#allocation5], 128  }
  0x65   : > { %1760 = vsyncadd (%p50_p1), [#allocation5], 4294967168 }
  0x66   : > { %1762 = dma.done.wait (%p50_p1), [#allocation10], 128  }
  0x67   : > { %1764 = vsyncadd (%p50_p1), [#allocation10], 4294967168 }
  0x68   : > { %357 = sfence }
  0x69   : > { %v2004_v0 = vld [vmem:[%s1981_s24] sm:$0xff]  ;;  %s2993_s18 = smov 1   ;;  %s1788_s11 = smov 17   ;;  %v2011_v1 = vld [vmem:[%s1981_s24 + $0x8] sm:$0xff]  ;;  %v1108_v3 = vld [vmem:[%s1989_s23 + $0x10] sm:$0xff]  ;;  %v393_v4 = vlaneseq }
  0x6a   : > { %421 = vrot.lane.b32.xlu1 %v2004_v0, %s2993_s18  ;;  %406 = vrot.lane.b32.xlu0 %v2004_v0, %s1788_s11  ;;  %s1789_s19 = smov 113   ;;  %s1790_s13 = smov 16   ;;  %v1106_v2 = vld [vmem:[%s1989_s23] sm:$0xff]  ;;  %v1107_v8 = vld [vmem:[%s1989_s23 + $0x8] sm:$0xff] }
  0x6b   : > { %434 = vrot.lane.b32.xlu2 %v2004_v0, %s1789_s19  ;;  %s1791_s14 = smov 112   ;;  %s1792_s17 = smov 15   ;;  %v2070_v5 = vand.u32 127, %v393_v4 }
  0x6c   : > { %s2989_s25 = smov 127   ;;  %s1794_s29 = smov 111  }
  0x6d   : > { %s2995_s15 = smov 4   ;;  %s2991_s3 = smov 3   ;;  %v2081_v7 = vadd.s32 128, %v2070_v5  ;;  %v396_v10 = vand.u32 15, %v2070_v5  ;;  %vm438_vm2 = vcmp.lt.s32.totalorder %v2070_v5, 113  ;;  %vm402_vm5 = vcmp.ge.s32.totalorder %v2070_v5, 16 }
  0x6e   : > { %s2032_s21 = sld [smem:[#allocation8 + $0x2]]  ;;  %s3041_s7 = smov 4   ;;  %vm425_vm6 = vcmp.lt.s32.totalorder %v2070_v5, 1  ;;  %vm410_vm7 = vcmp.lt.s32.totalorder %v2070_v5, 17  ;;  %vm453_vm9 = vcmp.lt.s32.totalorder %v2070_v5, 16  ;;  %vm466_vm11 = vcmp.lt.s32.totalorder %v2070_v5, 112 }
  0x6f   : > { %s2034_s20 = sld [smem:[#allocation8 + $0x82]]  ;;  %v397_v9 = vand.u32 15, %v2081_v7  ;;  %vm405_vm1 = vcmp.lt.s32.totalorder %v2081_v7, 240  ;;  %vm2128_vm3 = vcmp.ge.s32.totalorder %v396_v10, 1  ;;  %vm2294_vm10 = vcmp.lt.s32.totalorder %v396_v10, 15 }
  0x70   : > { %s2036_s2 = sld [smem:[#allocation8 + $0x102]]  ;;  %vm2227_vm8 = vmand %vm2128_vm3, %vm402_vm5  ;;  %vm479_vm12 = vcmp.lt.s32.totalorder %v2070_v5, 15  ;;  %vm494_vm14 = vcmp.lt.s32.totalorder %v2070_v5, 127 }
  0x71   : > { %s2038_s22 = sld [smem:[#allocation8 + $0x182]]  ;;  %vm2105_vm0 = vcmp.ge.s32.totalorder %v397_v9, 1  ;;  %vm2350_vm13 = vcmp.lt.s32.totalorder %v397_v9, 15  ;;  %vm2450_vm15 = vmand %vm2294_vm10, %vm402_vm5 }
  0x72   : > { %423 = vrot.lane.b32.xlu1 %v2011_v1, %s2993_s18  ;;  %408 = vrot.lane.b32.xlu0 %v2011_v1, %s1788_s11  ;;  %s2040_s12 = sld [smem:[#allocation8 + $0x202]]  ;;  %vm2136_vm4 = vmand %vm2105_vm0, %vm405_vm1 }
  0x73   : > { %436 = vrot.lane.b32.xlu2 %v2011_v1, %s1789_s19  ;;  %s2042_s16 = sld [smem:[#allocation8 + $0x282]] }
  0x74   : > { %s2045_s11 = sld [smem:[#allocation8 + $0x302]]  ;;  %v536_v12 = vstv %s2032_s21 }
  0x75   : > { %s2048_s19 = sld [smem:[#allocation8 + $0x382]]  ;;  %v604_v14 = vstv %s2034_s20 }
  0x76   : > { %s2058_s10 = sld [smem:[#allocation8 + $0x201]]  ;;  %v672_v15 = vstv %s2036_s2 }
  0x77   : > { %s2064_s18 = sld [smem:[#allocation8 + $0x381]]  ;;  %v740_v16 = vstv %s2038_s22 }
  0x78   : > { %s2068_s0 = sld [smem:[#allocation8 + $0x80]]  ;;  %v808_v17 = vstv %s2040_s12 }
  0x79   : > { %s2072_s1 = sld [smem:[#allocation8 + $0x100]]  ;;  %v876_v18 = vstv %s2042_s16 }
  0x7a   : > { %451 = vrot.lane.b32.xlu1 %v2011_v1, %s1790_s13  ;;  %449 = vrot.lane.b32.xlu0 %v2004_v0, %s1790_s13  ;;  %s2050_s13 = sld [smem:[#allocation8 + $0x1]]  ;;  %v944_v19 = vstv %s2045_s11 }
  0x7b   : > { %462 = vrot.lane.b32.xlu2 %v2004_v0, %s1791_s14  ;;  %s2074_s28 = sld [smem:[#allocation8 + $0x180]]  ;;  %v1012_v20 = vstv %s2048_s19 }
  0x7c   : > { %s2076_s27 = sld [smem:[#allocation8 + $0x200]]  ;;  %v802_v29 = vstv %s2058_s10 }
  0x7d   : > { %s2078_s26 = sld [smem:[#allocation8 + $0x280]]  ;;  %v1006_v32 = vstv %s2064_s18 }
  0x7e   : > { %s2083_s8 = sld [smem:[#allocation8 + $0x300]]  ;;  %v592_v36 = vstv %s2068_s0 }
  0x7f   : > { %s2085_s30 = sld [smem:[#allocation8 + $0x380]]  ;;  %v660_v37 = vstv %s2072_s1 }
  0x80   : > { %s2088_s9 = sld [smem:[#allocation8 + $0x3]]  ;;  %v530_v21 = vstv %s2050_s13 }
  0x81   : > { %s2091_s6 = sld [smem:[#allocation8 + $0x83]]  ;;  %v728_v38 = vstv %s2074_s28 }
  0x82   : > { %475 = vrot.lane.b32.xlu1 %v2004_v0, %s1792_s17  ;;  %464 = vrot.lane.b32.xlu0 %v2011_v1, %s1791_s14  ;;  %s2052_s14 = sld [smem:[#allocation8 + $0x81]]  ;;  %v796_v39 = vstv %s2076_s27 }
  0x83   : > { %477 = vrot.lane.b32.xlu2 %v2011_v1, %s1792_s17  ;;  %s2054_s17 = sld [smem:[#allocation8 + $0x101]]  ;;  %v864_v40 = vstv %s2078_s26 }
  0x84   : > { %s2094_s5 = sld [smem:[#allocation8 + $0x103]]  ;;  %v932_v41 = vstv %s2083_s8 }
  0x85   : > { %s2096_s4 = sld [smem:[#allocation8 + $0x183]] }
  0x86   : > { %s2098_s24 = sld [smem:[#allocation8 + $0x203]] }
  0x87   : > { %s2101_s23 = sld [smem:[#allocation8 + $0x283]] }
  0x88   : > { %s2124_s21 = sld [smem:[#allocation8 + $0x104]]  ;;  %v598_v26 = vstv %s2052_s14 }
  0x89   : > { %s2145_s20 = sld [smem:[#allocation8 + $0x105]]  ;;  %v666_v27 = vstv %s2054_s17 }
  0x8a   : > { %492 = vrot.lane.b32.xlu1 %v2011_v1, %s2989_s25  ;;  %490 = vrot.lane.b32.xlu0 %v2004_v0, %s2989_s25  ;;  %s2060_s25 = sld [smem:[#allocation8 + $0x281]] }
  0x8b   : > { %503 = vrot.lane.b32.xlu2 %v2004_v0, %s1794_s29  ;;  %s2151_s2 = sld [smem:[#allocation8 + $0x84]] }
  0x8c   : > { %s2157_s22 = sld [smem:[#allocation8 + $0x106]] }
  0x8d   : > { %3042 = sst [smem:[#allocation29_spill]] %s2101_s23 }
  0x8e   : > { %s2118_s23 = sld [smem:[#allocation8 + $0x383]]  ;;  %v684_v59 = vstv %s2124_s21 }
  0x8f   : > { %s2167_s12 = sld [smem:[#allocation8 + $0x85]] }
  0x90   : > { %v870_v30 = vstv %s2060_s25  ;;  %s2173_s16 = sld [smem:[#allocation8 + $0x86]] }
  0x91   : > { %s2179_s11 = sld [smem:[#allocation8 + $0x4]]  ;;  %v616_v63 = vstv %s2151_s2 }
  0x92   : > { %505 = vrot.lane.b32.xlu0 %v2011_v1, %s1794_s29  ;;  %1109 = vrot.lane.b32.xlu1 %v1106_v2, %s2995_s15  ;;  %s2056_s29 = sld [smem:[#allocation8 + $0x181]] }
  0x93   : > { %1111 = vrot.lane.b32.xlu2 %v1107_v8, %s3041_s7  ;;  %s2112_s7 = sld [smem:[#allocation8 + $0x303]] }
  0x94   : > { %s3049_s19 = sld [smem:[#allocation29_spill]] }
  0x95   : > { %s2314_s13 = sld [smem:[#allocation8 + $0x107]] }
  0x96   : > { %s2334_s10 = sld [smem:[#allocation8 + $0x108]] }
  0x97   : > { %s2354_s18 = sld [smem:[#allocation9 + $0x100]] }
  0x98   : > { %v734_v28 = vstv %s2056_s29  ;;  %s2432_s0 = sld [smem:[#allocation8 + $0x87]] }
  0x99   : > { %s2444_s1 = sld [smem:[#allocation8 + $0x88]] }
  0x9a   : > { %1127 = vrot.lane.b32.xlu0 %v1106_v2, %s2991_s3  ;;  %1113 = vrot.lane.b32.xlu1 %v1108_v3, %s2995_s15  ;;  %s2062_s3 = sld [smem:[#allocation8 + $0x301]] }
  0x9b   : > { %s2066_s15 = sld [smem:[#allocation8]] }
  0x9c   : > { %s2458_s8 = sld [smem:[#allocation9 + $0x80]] }
  0x9d   : > { %s2524_s27 = sld [smem:[#allocation8 + $0x7]] }
  0x9e   : > { %s2554_s28 = sld [smem:[#allocation8 + $0x8]] }
  0x9f   : > { %s2595_s26 = sld [smem:[#allocation8 + $0x304]] }
  0xa0   : > { %v938_v31 = vstv %s2062_s3  ;;  %s2601_s25 = sld [smem:[#allocation8 + $0x306]] }
  0xa1   : > { %v524_v33 = vstv %s2066_s15  ;;  %s2605_s15 = sld [smem:[#allocation8 + $0x307]] }
  0xa2   : > { %s2615_s3 = sld [smem:[#allocation8 + $0x308]] }
  0xa3   : > { %s2621_s14 = sld [smem:[#allocation9 + $0x300]] }
  0xa4   : > { %s2625_s17 = sld [smem:[#allocation8 + $0x184]] }
  0xa5   : > { %s2631_s29 = sld [smem:[#allocation8 + $0x185]] }
  0xa6   : > { %s2635_s21 = sld [smem:[#allocation8 + $0x186]] }
  0xa7   : > { %s2663_s2 = sld [smem:[#allocation9 + $0x180]] }
  0xc5   : > { %v435_v6 = vpop.permute.xlu2 %434 }
  0xcd   : > { %v437_v13 = vpop.permute.xlu2 %436 }
  0xce   : > { %v439_v24 = vsel %vm438_vm2, %v435_v6, %v437_v13  ;;  %v440_v25 = vsel %vm438_vm2, %v437_v13, %v435_v6  ;;  %vm511_vm2 = vmand %vm2350_vm13, %vm405_vm1 }
  0xcf   : > { %v447_v34 = vsel %vm2128_vm3, %v439_v24, 0.0  ;;  %v448_v35 = vsel %vm2136_vm4, %v440_v25, 0.0  ;;  %v2241_v24 = vmul.f32 %v616_v63, %v2004_v0  ;;  %vm1150_vm4 = vcmp.lt.s32.totalorder %v2070_v5, 2 }
  0xd0   : > { %v2181_v48 = vmul.f32 %v536_v12, %v447_v34  ;;  %v2183_v49 = vmul.f32 %v536_v12, %v448_v35  ;;  %v2185_v50 = vmul.f32 %v604_v14, %v447_v34  ;;  %v2187_v51 = vmul.f32 %v604_v14, %v448_v35 }
  0xd1   : > { %v2189_v52 = vmul.f32 %v672_v15, %v447_v34  ;;  %v2191_v53 = vmul.f32 %v672_v15, %v448_v35  ;;  %v2193_v54 = vmul.f32 %v740_v16, %v447_v34  ;;  %v2195_v55 = vmul.f32 %v740_v16, %v448_v35 }
  0xd2   : > { %v2197_v56 = vmul.f32 %v808_v17, %v447_v34  ;;  %v2199_v57 = vmul.f32 %v808_v17, %v448_v35  ;;  %v2201_v58 = vmul.f32 %v876_v18, %v447_v34  ;;  %v2204_v60 = vmul.f32 %v876_v18, %v448_v35 }
  0xd3   : > { %v2206_v61 = vmul.f32 %v944_v19, %v447_v34  ;;  %v2208_v62 = vmul.f32 %v944_v19, %v448_v35  ;;  %v2211_v2 = vmul.f32 %v1012_v20, %v447_v34  ;;  %v2213_v3 = vmul.f32 %v1012_v20, %v448_v35 }
  0xd4   : > { %3050 = vst [vmem:[#allocation30_spill] sm:$0xff] %v2201_v58  ;;  %v2221_v14 = vmul.f32 %v684_v59, %v2011_v1  ;;  %v2232_v16 = vmul.f32 %v684_v59, %v2004_v0  ;;  %v2237_v19 = vmul.f32 %v616_v63, %v2011_v1 }
  0xd5   : > { %3051 = vst [vmem:[#allocation31_spill] sm:$0xff] %v2204_v60 }
  0xd6   : > { %3052 = vst [vmem:[#allocation32_spill] sm:$0xff] %v2211_v2 }
  0xd7   : > { %3053 = vst [vmem:[#allocation33_spill] sm:$0xff] %v2213_v3  ;;  %v3066_v3 = vstv %s2085_s30  ;;  %s2599_s30 = sld [smem:[#allocation8 + $0x305]] }
  0xdc   : > { %v422_v42 = vpop.permute.xlu1 %421  ;;  %v407_v43 = vpop.permute.xlu0 %406 }
  0xe4   : > { %v424_v20 = vpop.permute.xlu1 %423  ;;  %v409_v23 = vpop.permute.xlu0 %408 }
  0xe5   : > { %v426_v59 = vsel %vm425_vm6, %v422_v42, %v424_v20  ;;  %v427_v18 = vsel %vm425_vm6, %v424_v20, %v422_v42  ;;  %v411_v17 = vsel %vm410_vm7, %v407_v43, %v409_v23  ;;  %v412_v63 = vsel %vm410_vm7, %v409_v23, %v407_v43 }
  0xe6   : > { %v432_v34 = vsel %vm2128_vm3, %v427_v18, 0.0  ;;  %v433_v35 = vsel %vm2105_vm0, %v426_v59, 0.0  ;;  %v419_v25 = vsel %vm2227_vm8, %v412_v63, 0.0  ;;  %v420_v42 = vsel %vm2105_vm0, %v411_v17, 0.0 }
  0xe7   : > { %v2264_v20 = vmul.f32 %v530_v21, %v432_v34  ;;  %v2268_v22 = vmul.f32 %v530_v21, %v433_v35  ;;  %v2272_v43 = vmul.f32 %v598_v26, %v432_v34  ;;  %v2276_v15 = vmul.f32 %v598_v26, %v433_v35  ;;  %v2290_v21 = vpop.permute.xlu2 %462 }
  0xe8   : > { %v667_v18 = vmul.f32 %v666_v27, %v432_v34  ;;  %v668_v11 = vmul.f32 %v666_v27, %v433_v35  ;;  %v2284_v17 = vmul.f32 %v734_v28, %v432_v34  ;;  %v2288_v23 = vmul.f32 %v734_v28, %v433_v35 }
  0xe9   : > { %v2300_v27 = vmul.f32 %v802_v29, %v432_v34  ;;  %v2304_v59 = vmul.f32 %v802_v29, %v433_v35  ;;  %v2308_v28 = vmul.f32 %v870_v30, %v432_v34  ;;  %v2312_v63 = vmul.f32 %v870_v30, %v433_v35 }
  0xea   : > { %v2318_v10 = vmul.f32 %v938_v31, %v432_v34  ;;  %v2322_v13 = vmul.f32 %v938_v31, %v433_v35  ;;  %v2326_v29 = vmul.f32 %v1006_v32, %v432_v34  ;;  %v2330_v12 = vmul.f32 %v1006_v32, %v433_v35 }
  0xeb   : > { %3058 = vst [vmem:[#allocation34_spill] sm:$0xff] %v2308_v28  ;;  %v2338_v30 = vmul.f32 %v524_v33, %v419_v25  ;;  %v2342_v31 = vmul.f32 %v524_v33, %v420_v42  ;;  %v593_v32 = vmul.f32 %v592_v36, %v419_v25  ;;  %v594_v34 = vmul.f32 %v592_v36, %v420_v42 }
  0xec   : > { %3059 = vst [vmem:[#allocation35_spill] sm:$0xff] %v2312_v63  ;;  %v661_v8 = vmul.f32 %v660_v37, %v419_v25  ;;  %v662_v33 = vmul.f32 %v660_v37, %v420_v42  ;;  %v2362_v6 = vmul.f32 %v728_v38, %v419_v25  ;;  %v2366_v4 = vmul.f32 %v728_v38, %v420_v42  ;;  %v452_v36 = vpop.permute.xlu1 %451  ;;  %v450_v47 = vpop.permute.xlu0 %449 }
  0xed   : > { %3060 = vst [vmem:[#allocation36_spill] sm:$0xff] %v2326_v29  ;;  %v2370_v9 = vmul.f32 %v796_v39, %v419_v25  ;;  %v2374_v46 = vmul.f32 %v796_v39, %v420_v42  ;;  %v2378_v37 = vmul.f32 %v864_v40, %v419_v25  ;;  %v2382_v38 = vmul.f32 %v864_v40, %v420_v42 }
  0xee   : > { %3061 = vst [vmem:[#allocation37_spill] sm:$0xff] %v2330_v12  ;;  %v2386_v45 = vmul.f32 %v932_v41, %v419_v25  ;;  %v2390_v44 = vmul.f32 %v932_v41, %v420_v42  ;;  %v2394_v2 = vmul.f32 %v3066_v3, %v419_v25  ;;  %v3068_v39 = vmov %v3066_v3 }
  0xef   : > { %3064 = vst [vmem:[#allocation38_spill] sm:$0xff] %v2378_v37  ;;  %v2398_v12 = vmul.f32 %v3068_v39, %v420_v42  ;;  %v454_v29 = vsel %vm453_vm9, %v450_v47, %v452_v36  ;;  %v455_v40 = vsel %vm453_vm9, %v452_v36, %v450_v47  ;;  %v669_v60 = vadd.f32 %v667_v18, %v661_v8 }
  0xf0   : > { %3065 = vst [vmem:[#allocation39_spill] sm:$0xff] %v2382_v38  ;;  %v670_v58 = vadd.f32 %v668_v11, %v662_v33  ;;  %v2406_v41 = vsel %vm402_vm5, %v455_v40, 0.0  ;;  %v3070_v63 = vstv %s2088_s9  ;;  %v3071_v3 = vstv %s2091_s6 }
  0xf1   : > { %3067 = vst [vmem:[#allocation40_spill] sm:$0xff] %v2394_v2  ;;  %v2410_v38 = vmul.f32 %v3070_v63, %v454_v29  ;;  %v612_v25 = vmul.f32 %v3071_v3, %v454_v29  ;;  %v3072_v42 = vstv %s2094_s5  ;;  %v3074_v47 = vstv %s2098_s24  ;;  %v478_v3 = vpop.permute.xlu2 %477 }
  0xf2   : > { %3069 = vst [vmem:[#allocation41_spill] sm:$0xff] %v2398_v12  ;;  %v680_v39 = vmul.f32 %v3072_v42, %v454_v29  ;;  %v3073_v12 = vstv %s2096_s4  ;;  %v2422_v8 = vmul.f32 %v3074_v47, %v454_v29  ;;  %v3076_v18 = vstv %s3049_s19 }
  0xf3   : > { %v2418_v2 = vmul.f32 %v3073_v12, %v454_v29  ;;  %v2426_v11 = vmul.f32 %v3076_v18, %v454_v29  ;;  %v3078_v33 = vstv %s2112_s7  ;;  %v3079_v63 = vstv %s2118_s23 }
  0xf4   : > { %3075 = vst [vmem:[#allocation42_spill] sm:$0xff] %v2422_v8  ;;  %v2430_v36 = vmul.f32 %v3078_v33, %v454_v29  ;;  %v2436_v40 = vmul.f32 %v3079_v63, %v454_v29  ;;  %v675_v12 = vadd.f32 %v2189_v52, %v669_v60  ;;  %v676_v42 = vadd.f32 %v2191_v53, %v670_v58  ;;  %v476_v53 = vpop.permute.xlu1 %475  ;;  %v465_v58 = vpop.permute.xlu0 %464 }
  0xf5   : > { %3077 = vst [vmem:[#allocation43_spill] sm:$0xff] %v2426_v11  ;;  %v3081_v47 = vstv %s2094_s5  ;;  %v702_v33 = vstv %s2314_s13  ;;  %v601_v52 = vadd.f32 %v2272_v43, %v593_v32  ;;  %v602_v11 = vadd.f32 %v2276_v15, %v594_v34  ;;  %s2513_s5 = sld [smem:[#allocation8 + $0x5]] }
  0xf6   : > { %3080 = vst [vmem:[#allocation44_spill] sm:$0xff] %v2436_v40  ;;  %v679_v18 = vmul.f32 %v3081_v47, %v2406_v41  ;;  %v682_v47 = vadd.f32 %v680_v39, %v676_v42  ;;  %v3084_v28 = vstv %s2091_s6  ;;  %v2467_v43 = vsel %vm466_vm11, %v2290_v21, %v465_v58  ;;  %s2520_s6 = sld [smem:[#allocation8 + $0x6]] }
  0xf7   : > { %v611_v37 = vmul.f32 %v3084_v28, %v2406_v41  ;;  %v468_v32 = vsel %vm466_vm11, %v465_v58, %v2290_v21  ;;  %v481_v15 = vsel %vm479_vm12, %v478_v3, %v476_v53  ;;  %v3087_v29 = vstv %s2157_s22  ;;  %s2671_s22 = sld [smem:[#allocation8 + $0x204]] }
  0xf8   : > { %v681_v60 = vadd.f32 %v679_v18, %v675_v12  ;;  %v480_v12 = vsel %vm479_vm12, %v476_v53, %v478_v3  ;;  %v2478_v28 = vsel %vm405_vm1, %v468_v32, 0.0  ;;  %v2482_v34 = vsel %vm2450_vm15, %v481_v15, 0.0  ;;  %s2702_s13 = sld [smem:[#allocation9 + $0x200]] }
  0xf9   : > { %v2486_v39 = vsel %vm2350_vm13, %v480_v12, 0.0  ;;  %v688_v42 = vadd.f32 %v2221_v14, %v682_v47  ;;  %v3085_v18 = vstv %s2145_s20  ;;  %v697_v32 = vmul.f32 %v3087_v29, %v2482_v34  ;;  %s2647_s20 = sld [smem:[#allocation8 + $0x188]] }
  0xfa   : > { %v687_v21 = vadd.f32 %v2232_v16, %v681_v60  ;;  %v691_v3 = vmul.f32 %v3085_v18, %v2467_v43  ;;  %v3086_v53 = vmov %v3085_v18  ;;  %v3088_v15 = vmov %v3087_v29 }
  0xfb   : > { %v692_v58 = vmul.f32 %v3086_v53, %v2478_v28  ;;  %v698_v40 = vmul.f32 %v3088_v15, %v2486_v39  ;;  %v607_v12 = vadd.f32 %v2185_v50, %v601_v52  ;;  %v608_v16 = vadd.f32 %v2187_v51, %v602_v11 }
  0xfc   : > { %v3089_v14 = vstv %s2167_s12  ;;  %v693_v47 = vadd.f32 %v691_v3, %v687_v21  ;;  %v3091_v8 = vstv %s2173_s16  ;;  %vm507_vm0 = vcmp.lt.s32.totalorder %v2070_v5, 111  ;;  %s2682_s12 = sld [smem:[#allocation8 + $0x206]] }
  0xfd   : > { %v623_v60 = vmul.f32 %v3089_v14, %v2467_v43  ;;  %v694_v18 = vadd.f32 %v692_v58, %v688_v42  ;;  %v3090_v63 = vmov %v3089_v14  ;;  %v629_v29 = vmul.f32 %v3091_v8, %v2482_v34  ;;  %v491_v58 = vpop.permute.xlu0 %490  ;;  %s2686_s16 = sld [smem:[#allocation8 + $0x207]] }
  0xfe   : > { %v624_v53 = vmul.f32 %v3090_v63, %v2478_v28  ;;  %v613_v50 = vadd.f32 %v611_v37, %v607_v12  ;;  %v614_v52 = vadd.f32 %v612_v25, %v608_v16  ;;  %v3092_v51 = vmov %v3091_v8  ;;  %v493_v8 = vpop.permute.xlu1 %492 }
  0xff   : > { %v630_v11 = vmul.f32 %v3092_v51, %v2486_v39  ;;  %v634_v15 = vstv %s2432_s0  ;;  %v699_v21 = vadd.f32 %v697_v32, %v693_v47  ;;  %v700_v42 = vadd.f32 %v698_v40, %v694_v18  ;;  %s2723_s0 = sld [smem:[#allocation8 + $0x287]] }
 0x100   : > { %v640_v63 = vstv %s2444_s1  ;;  %v619_v14 = vadd.f32 %v2241_v24, %v613_v50  ;;  %v620_v37 = vadd.f32 %v2237_v19, %v614_v52  ;;  %v533_v25 = vadd.f32 %v2264_v20, %v2338_v30  ;;  %s2728_s1 = sld [smem:[#allocation8 + $0x288]] }
 0x101   : > { %v534_v12 = vadd.f32 %v2268_v22, %v2342_v31  ;;  %v495_v32 = vsel %vm494_vm14, %v491_v58, %v493_v8  ;;  %v496_v40 = vsel %vm494_vm14, %v493_v8, %v491_v58  ;;  %v3093_v16 = vstv %s2088_s9  ;;  %s2558_s9 = sld [smem:[#allocation9]] }
 0x102   : > { %v543_v47 = vmul.f32 %v3093_v16, %v2406_v41  ;;  %v3094_v18 = vstv %s2179_s11  ;;  %v2544_v19 = vsel %vm2294_vm10, %v495_v32, 0.0  ;;  %v2548_v20 = vsel %vm2350_vm13, %v496_v40, 0.0  ;;  %v504_v16 = vpop.permute.xlu2 %503  ;;  %s2690_s11 = sld [smem:[#allocation8 + $0x208]] }
 0x103   : > { %v549_v24 = vmul.f32 %v3094_v18, %v2004_v0  ;;  %v625_v22 = vadd.f32 %v623_v60, %v619_v14  ;;  %v626_v30 = vadd.f32 %v624_v53, %v620_v37  ;;  %v703_v31 = vmul.f32 %v702_v33, %v2544_v19 }
 0x104   : > { %v704_v50 = vmul.f32 %v702_v33, %v2548_v20  ;;  %v635_v52 = vmul.f32 %v634_v15, %v2544_v19  ;;  %v636_v51 = vmul.f32 %v634_v15, %v2548_v20  ;;  %v539_v32 = vadd.f32 %v2181_v48, %v533_v25 }
 0x105   : > { %v631_v8 = vadd.f32 %v629_v29, %v625_v22  ;;  %v632_v58 = vadd.f32 %v630_v11, %v626_v30  ;;  %v540_v40 = vadd.f32 %v2183_v49, %v534_v12  ;;  %v705_v60 = vadd.f32 %v703_v31, %v699_v21 }
 0x106   : > { %v706_v53 = vadd.f32 %v704_v50, %v700_v42  ;;  %v3095_v33 = vmov %v3094_v18  ;;  %v554_v37 = vstv %s2513_s5  ;;  %v545_v3 = vadd.f32 %v543_v47, %v539_v32  ;;  %v506_v42 = vpop.permute.xlu0 %505  ;;  %s2731_s5 = sld [smem:[#allocation9 + $0x280]] }
 0x107   : > { %v550_v14 = vmul.f32 %v3095_v33, %v2011_v1  ;;  %v637_v15 = vadd.f32 %v635_v52, %v631_v8  ;;  %v638_v18 = vadd.f32 %v636_v51, %v632_v58  ;;  %v546_v29 = vadd.f32 %v2410_v38, %v540_v40 }
 0x108   : > { %v555_v48 = vmul.f32 %v554_v37, %v2467_v43  ;;  %v556_v49 = vmul.f32 %v554_v37, %v2478_v28  ;;  %v560_v11 = vstv %s2520_s6  ;;  %v566_v21 = vstv %s2524_s27  ;;  %s2745_s6 = sld [smem:[#allocation8 + $0x384]] }
 0x109   : > { %v551_v25 = vadd.f32 %v549_v24, %v545_v3  ;;  %v552_v12 = vadd.f32 %v550_v14, %v546_v29  ;;  %v561_v47 = vmul.f32 %v560_v11, %v2482_v34  ;;  %v562_v38 = vmul.f32 %v560_v11, %v2486_v39  ;;  %s2754_s27 = sld [smem:[#allocation8 + $0x386]] }
 0x10a   : > { %v508_v7 = vsel %vm507_vm0, %v504_v16, %v506_v42  ;;  %v509_v35 = vsel %vm507_vm0, %v506_v42, %v504_v16  ;;  %v567_v22 = vmul.f32 %v566_v21, %v2544_v19  ;;  %v568_v30 = vmul.f32 %v566_v21, %v2548_v20 }
 0x10b   : > { %v2583_v3 = vsel %vm2294_vm10, %v508_v7, 0.0  ;;  %v2585_v24 = vsel %vm511_vm2, %v509_v35, 0.0  ;;  %v557_v31 = vadd.f32 %v555_v48, %v551_v25  ;;  %v558_v50 = vadd.f32 %v556_v49, %v552_v12 }
 0x10c   : > { %v3096_v52 = vstv %s2334_s10  ;;  %v641_v32 = vmul.f32 %v640_v63, %v2583_v3  ;;  %v642_v40 = vmul.f32 %v640_v63, %v2585_v24  ;;  %v572_v14 = vstv %s2554_s28  ;;  %s2707_s10 = sld [smem:[#allocation8 + $0x284]] }
 0x10d   : > { %v709_v51 = vmul.f32 %v3096_v52, %v2583_v3  ;;  %v3097_v8 = vmov %v3096_v52  ;;  %v563_v26 = vadd.f32 %v561_v47, %v557_v31  ;;  %v564_v33 = vadd.f32 %v562_v38, %v558_v50  ;;  %s2763_s28 = sld [smem:[#allocation8 + $0x387]] }
 0x10e   : > { %v710_v58 = vmul.f32 %v3097_v8, %v2585_v24  ;;  %v578_v37 = vstv %s2558_s9  ;;  %v643_v48 = vadd.f32 %v641_v32, %v637_v15  ;;  %v644_v49 = vadd.f32 %v642_v40, %v638_v18  ;;  %s2766_s9 = sld [smem:[#allocation8 + $0x388]] }
 0x10f   : > { %v711_v16 = vadd.f32 %v709_v51, %v705_v60  ;;  %v569_v11 = vadd.f32 %v567_v22, %v563_v26  ;;  %v570_v63 = vadd.f32 %v568_v30, %v564_v33  ;;  %v573_v21 = vmul.f32 %v572_v14, %v2583_v3 }
 0x110   : > { %v712_v29 = vadd.f32 %v710_v58, %v706_v53  ;;  %v574_v42 = vmul.f32 %v572_v14, %v2585_v24  ;;  %v3098_v25 = vstv %s2354_s18  ;;  %v3100_v7 = vstv %s2458_s8  ;;  %s2720_s18 = sld [smem:[#allocation8 + $0x286]] }
 0x111   : > { %v715_v12 = vadd.f32 %v3098_v25, %v711_v16  ;;  %v3099_v47 = vmov %v3098_v25  ;;  %v647_v35 = vadd.f32 %v3100_v7, %v643_v48  ;;  %v3101_v60 = vmov %v3100_v7  ;;  %s3106_s8 = sld [smem:[#allocation27_spill]] }
 0x112   : > { %v716_v38 = vadd.f32 %v3099_v47, %v712_v29  ;;  %v648_v53 = vadd.f32 %v3101_v60, %v644_v49  ;;  %v575_v15 = vadd.f32 %v573_v21, %v569_v11  ;;  %v576_v18 = vadd.f32 %v574_v42, %v570_v63 }
 0x113   : > { %v941_v22 = vadd.f32 %v2318_v10, %v2386_v45  ;;  %v942_v30 = vadd.f32 %v2322_v13, %v2390_v44  ;;  %v717_v31 = vmax.f32 %v715_v12, 0.0  ;;  %v649_v52 = vmax.f32 %v647_v35, 0.0 }
 0x114   : > { %v718_v50 = vmax.f32 %v716_v38, 0.0  ;;  %v650_v51 = vmax.f32 %v648_v53, 0.0  ;;  %v579_v8 = vadd.f32 %v578_v37, %v575_v15  ;;  %v580_v58 = vadd.f32 %v578_v37, %v576_v18 }
 0x115   : > { %v947_v32 = vadd.f32 %v2206_v61, %v941_v22  ;;  %v948_v40 = vadd.f32 %v2208_v62, %v942_v30  ;;  %v3102_v44 = vstv %s2112_s7  ;;  %v956_v26 = vstv %s2595_s26  ;;  %s2643_s7 = sld [smem:[#allocation8 + $0x187]] }
 0x116   : > { %v719_v45 = vadd.f32 %v718_v50, %v717_v31  ;;  %v651_v10 = vadd.f32 %v650_v51, %v649_v52  ;;  %v951_v13 = vmul.f32 %v3102_v44, %v2406_v41  ;;  %v581_v33 = vmax.f32 %v579_v8, 0.0  ;;  %s3122_s26 = sld [smem:[#allocation28_spill]] }
 0x117   : > { %v582_v14 = vmax.f32 %v580_v58, 0.0  ;;  %v954_v37 = vadd.f32 %v2430_v36, %v948_v40  ;;  %v957_v61 = vmul.f32 %v956_v26, %v2004_v0  ;;  %v958_v16 = vmul.f32 %v956_v26, %v2011_v1 }
 0x118   : > { %720 = vadd.xlane.f32.xlu0 %v719_v45  ;;  %652 = vadd.xlane.f32.xlu2 %v651_v10  ;;  %v953_v62 = vadd.f32 %v951_v13, %v947_v32  ;;  %v962_v29 = vstv %s2599_s30  ;;  %v968_v48 = vstv %s2601_s25  ;;  %v974_v12 = vstv %s2605_s15  ;;  %s1797_s30 = smov 2   ;;  %s3124_s25 = smov 1  }
 0x119   : > { %v583_v49 = vadd.f32 %v582_v14, %v581_v33  ;;  %v963_v11 = vmul.f32 %v962_v29, %v2467_v43  ;;  %v964_v63 = vmul.f32 %v962_v29, %v2478_v28  ;;  %v969_v36 = vmul.f32 %v968_v48, %v2482_v34  ;;  %s3125_s15 = smov 3  }
 0x11a   : > { %v959_v21 = vadd.f32 %v957_v61, %v953_v62  ;;  %v960_v42 = vadd.f32 %v958_v16, %v954_v37  ;;  %v970_v25 = vmul.f32 %v968_v48, %v2486_v39  ;;  %v975_v47 = vmul.f32 %v974_v12, %v2544_v19 }
 0x11b   : > { %584 = vadd.xlane.f32.xlu1 %v583_v49  ;;  %v976_v38 = vmul.f32 %v974_v12, %v2548_v20  ;;  %v980_v7 = vstv %s2615_s3  ;;  %v986_v35 = vstv %s2621_s14  ;;  %v737_v22 = vadd.f32 %v2284_v17, %v2362_v6 }
 0x11c   : > { %v965_v60 = vadd.f32 %v963_v11, %v959_v21  ;;  %v966_v53 = vadd.f32 %v964_v63, %v960_v42  ;;  %v981_v15 = vmul.f32 %v980_v7, %v2583_v3  ;;  %v982_v18 = vmul.f32 %v980_v7, %v2585_v24 }
 0x11d   : > { %v738_v30 = vadd.f32 %v2288_v23, %v2366_v4  ;;  %v3103_v31 = vstv %s2096_s4  ;;  %v752_v52 = vstv %s2625_s17  ;;  %v743_v40 = vadd.f32 %v2193_v54, %v737_v22  ;;  %s2678_s4 = sld [smem:[#allocation8 + $0x205]] }
 0x11e   : > { %v747_v50 = vmul.f32 %v3103_v31, %v2406_v41  ;;  %v971_v51 = vadd.f32 %v969_v36, %v965_v60  ;;  %v972_v8 = vadd.f32 %v970_v25, %v966_v53  ;;  %v753_v58 = vmul.f32 %v752_v52, %v2004_v0  ;;  %s3126_s17 = sld [smem:[#allocation49_spill]] }
 0x11f   : > { %v754_v32 = vmul.f32 %v752_v52, %v2011_v1  ;;  %v744_v6 = vadd.f32 %v2195_v55, %v738_v30  ;;  %v758_v17 = vstv %s2631_s29  ;;  %v764_v4 = vstv %s2635_s21 }
 0x120   : > { %v977_v23 = vadd.f32 %v975_v47, %v971_v51  ;;  %v978_v45 = vadd.f32 %v976_v38, %v972_v8  ;;  %v759_v10 = vmul.f32 %v758_v17, %v2467_v43  ;;  %v760_v44 = vmul.f32 %v758_v17, %v2478_v28 }
 0x121   : > { %v749_v13 = vadd.f32 %v747_v50, %v743_v40  ;;  %v750_v26 = vadd.f32 %v2418_v2, %v744_v6  ;;  %v765_v33 = vmul.f32 %v764_v4, %v2482_v34  ;;  %v766_v54 = vmul.f32 %v764_v4, %v2486_v39 }
 0x122   : > { %v983_v55 = vadd.f32 %v981_v15, %v977_v23  ;;  %v984_v14 = vadd.f32 %v982_v18, %v978_v45  ;;  %v770_v37 = vstv %s2643_s7  ;;  %v776_v61 = vstv %s2647_s20  ;;  %s3127_s7 = sld [smem:[#allocation50_spill]] }
 0x123   : > { %v755_v62 = vadd.f32 %v753_v58, %v749_v13  ;;  %v756_v16 = vadd.f32 %v754_v32, %v750_v26  ;;  %v771_v29 = vmul.f32 %v770_v37, %v2544_v19  ;;  %v772_v2 = vmul.f32 %v770_v37, %v2548_v20  ;;  %s3131_s20 = sld [smem:[#allocation21_spill]] }
 0x124   : > { %v987_v48 = vadd.f32 %v986_v35, %v983_v55  ;;  %v988_v49 = vadd.f32 %v986_v35, %v984_v14  ;;  %v777_v11 = vmul.f32 %v776_v61, %v2583_v3  ;;  %v778_v63 = vmul.f32 %v776_v61, %v2585_v24 }
 0x125   : > { %v761_v36 = vadd.f32 %v759_v10, %v755_v62  ;;  %v762_v21 = vadd.f32 %v760_v44, %v756_v16  ;;  %v782_v42 = vstv %s2663_s2  ;;  %v805_v25 = vadd.f32 %v2300_v27, %v2370_v9 }
 0x126   : > { %v989_v12 = vmax.f32 %v987_v48, 0.0  ;;  %v990_v47 = vmax.f32 %v988_v49, 0.0  ;;  %v806_v38 = vadd.f32 %v2304_v59, %v2374_v46  ;;  %v3104_v7 = vstv %s2098_s24  ;;  %s2710_s24 = sld [smem:[#allocation8 + $0x285]]  ;;  %v3109_v49 = vld [vmem:[#allocation39_spill] sm:$0xff] }
 0x127   : > { %v815_v35 = vmul.f32 %v3104_v7, %v2406_v41  ;;  %v767_v60 = vadd.f32 %v765_v33, %v761_v36  ;;  %v768_v53 = vadd.f32 %v766_v54, %v762_v21  ;;  %v811_v15 = vadd.f32 %v2197_v56, %v805_v25  ;;  %v3105_v56 = vld [vmem:[#allocation42_spill] sm:$0xff] }
 0x128   : > { %v820_v18 = vstv %s2671_s22  ;;  %v991_v22 = vadd.f32 %v990_v47, %v989_v12  ;;  %v812_v27 = vadd.f32 %v2199_v57, %v806_v38  ;;  %v826_v50 = vstv %s2678_s4  ;;  %v3112_v7 = vld [vmem:[#allocation30_spill] sm:$0xff]  ;;  %s3132_s22 = sld [smem:[#allocation26_spill]] }
 0x129   : > { %v821_v9 = vmul.f32 %v820_v18, %v2004_v0  ;;  %v822_v30 = vmul.f32 %v820_v18, %v2011_v1  ;;  %v773_v46 = vadd.f32 %v771_v29, %v767_v60  ;;  %v774_v59 = vadd.f32 %v772_v2, %v768_v53  ;;  %v3107_v29 = vld [vmem:[#allocation38_spill] sm:$0xff]  ;;  %v3113_v60 = vld [vmem:[#allocation31_spill] sm:$0xff]  ;;  %s1484_s2 = sshll.u32 %s3131_s20, 4 }
 0x12a   : > { %v817_v31 = vadd.f32 %v815_v35, %v811_v15  ;;  %992 = vadd.xlane.f32.xlu0 %v991_v22  ;;  %v818_v52 = vadd.f32 %v3105_v56, %v812_v27  ;;  %v827_v51 = vmul.f32 %v826_v50, %v2467_v43  ;;  %v828_v57 = vmul.f32 %v826_v50, %v2478_v28  ;;  %v3108_v2 = vld [vmem:[#allocation34_spill] sm:$0xff]  ;;  %v1610_v15 = vld [vmem:[%s3106_s8] sm:$0xff] }
 0x12b   : > { %v832_v0 = vstv %s2682_s12  ;;  %v779_v8 = vadd.f32 %v777_v11, %v773_v46  ;;  %v780_v58 = vadd.f32 %v778_v63, %v774_v59  ;;  %v838_v4 = vstv %s2686_s16  ;;  %v3110_v11 = vld [vmem:[#allocation35_spill] sm:$0xff]  ;;  %s3133_s16 = sld [smem:[#allocation53_spill]] }
 0x12c   : > { %v823_v32 = vadd.f32 %v821_v9, %v817_v31  ;;  %v833_v40 = vmul.f32 %v832_v0, %v2482_v34  ;;  %v824_v6 = vadd.f32 %v822_v30, %v818_v52  ;;  %v834_v17 = vmul.f32 %v832_v0, %v2486_v39  ;;  %v3114_v31 = vld [vmem:[#allocation43_spill] sm:$0xff] }
 0x12d   : > { %v844_v23 = vstv %s2690_s11  ;;  %v783_v45 = vadd.f32 %v782_v42, %v779_v8  ;;  %v784_v10 = vadd.f32 %v782_v42, %v780_v58  ;;  %v839_v13 = vmul.f32 %v838_v4, %v2544_v19 }
 0x12e   : > { %v829_v44 = vadd.f32 %v827_v51, %v823_v32  ;;  %v830_v26 = vadd.f32 %v828_v57, %v824_v6  ;;  %v840_v33 = vmul.f32 %v838_v4, %v2548_v20  ;;  %v845_v54 = vmul.f32 %v844_v23, %v2583_v3 }
 0x12f   : > { %v846_v55 = vmul.f32 %v844_v23, %v2585_v24  ;;  %v785_v14 = vmax.f32 %v783_v45, 0.0  ;;  %v786_v37 = vmax.f32 %v784_v10, 0.0  ;;  %v850_v62 = vstv %s2702_s13 }
 0x130   : > { %v835_v61 = vadd.f32 %v833_v40, %v829_v44  ;;  %v836_v16 = vadd.f32 %v834_v17, %v830_v26  ;;  %v873_v48 = vadd.f32 %v3108_v2, %v3107_v29  ;;  %v874_v63 = vadd.f32 %v3110_v11, %v3109_v49  ;;  %v3115_v26 = vld [vmem:[#allocation40_spill] sm:$0xff] }
 0x131   : > { %v3111_v36 = vstv %s3049_s19  ;;  %v787_v42 = vadd.f32 %v786_v37, %v785_v14  ;;  %v888_v12 = vstv %s2707_s10  ;;  %v894_v47 = vstv %s2710_s24  ;;  %s2750_s19 = sld [smem:[#allocation8 + $0x385]]  ;;  %v3118_v14 = vld [vmem:[#allocation37_spill] sm:$0xff]  ;;  %v3120_v49 = vld [vmem:[#allocation32_spill] sm:$0xff]  ;;  %s1266_s11 = scalar_lea.hbm %s3133_s16, %s1484_s2 }
 0x132   : > { %v883_v21 = vmul.f32 %v3111_v36, %v2406_v41  ;;  %v841_v25 = vadd.f32 %v839_v13, %v835_v61  ;;  %v842_v38 = vadd.f32 %v840_v33, %v836_v16  ;;  %v879_v35 = vadd.f32 %v3112_v7, %v873_v48  ;;  %v3116_v33 = vld [vmem:[#allocation36_spill] sm:$0xff]  ;;  %s3135_s10 = sshll.u32 %s3132_s22, 4 }
 0x133   : > { %v880_v53 = vadd.f32 %v3113_v60, %v874_v63  ;;  %v889_v18 = vmul.f32 %v1610_v15, %v888_v12  ;;  %788 = vadd.xlane.f32.xlu2 %v787_v42  ;;  %v890_v27 = vmul.f32 %v888_v12, %v2011_v1  ;;  %v895_v9 = vmul.f32 %v894_v47, %v2467_v43  ;;  %v3121_v63 = vld [vmem:[#allocation33_spill] sm:$0xff]  ;;  %s390_s24 = scalar_lea.vmem [#allocation11], %s3135_s10 }
 0x134   : > { %v847_v22 = vadd.f32 %v845_v54, %v841_v25  ;;  %v896_v30 = vmul.f32 %v894_v47, %v2478_v28  ;;  %v848_v46 = vadd.f32 %v846_v55, %v842_v38  ;;  %v885_v59 = vadd.f32 %v883_v21, %v879_v35  ;;  %v3117_v55 = vld [vmem:[#allocation41_spill] sm:$0xff] }
 0x135   : > { %v886_v50 = vadd.f32 %v3114_v31, %v880_v53  ;;  %v900_v56 = vstv %s2720_s18  ;;  %v906_v57 = vstv %s2723_s0  ;;  %v912_v17 = vstv %s2728_s1  ;;  %v1611_v42 = vld [vmem:[%s3106_s8 + $0x8] sm:$0xff]  ;;  %s1268_s18 = sshll.u32 %s390_s24, 4  ;;  %s1270_s0 = sshll.u32 %s1266_s11, 4  ;;  %s1269_s18 = int_to_ptr.vmem [resolvable:$true] %s1268_s18  ;;  %s1271_s0 = int_to_ptr.hbm [resolvable:$true] %s1270_s0 }
 0x136   : > { %v851_v52 = vadd.f32 %v850_v62, %v847_v22  ;;  %v901_v51 = vmul.f32 %v900_v56, %v2482_v34  ;;  %v902_v1 = vmul.f32 %v900_v56, %v2486_v39  ;;  %v852_v0 = vadd.f32 %v850_v62, %v848_v46  ;;  %s1255_s1 = scalar_lea.sflag [#allocation4], %s3132_s22  ;;  %s1719_s8 = sshra.s32 %s1271_s0, 4  ;;  %s1720_s8 = int_to_ptr.hbm [resolvable:$true] %s1719_s8 }
 0x137   : > { %v891_v8 = vadd.f32 %v889_v18, %v885_v59  ;;  %v892_v58 = vadd.f32 %v890_v27, %v886_v50  ;;  %v907_v32 = vmul.f32 %v906_v57, %v2544_v19  ;;  %v908_v6 = vmul.f32 %v906_v57, %v2548_v20  ;;  %p1726_p2 = scmp.lt.s32.totalorder %s1720_s8, %s3133_s16 }
 0x138   : > { %v853_v40 = vmax.f32 %v851_v52, 0.0  ;;  %v918_v4 = vstv %s2731_s5  ;;  %v854_v23 = vmax.f32 %v852_v0, 0.0  ;;  %v913_v44 = vmul.f32 %v912_v17, %v2583_v3  ;;  %s1801_s5 = smov 126  }
 0x139   : > { %v897_v45 = vadd.f32 %v895_v9, %v891_v8  ;;  %v898_v10 = vadd.f32 %v896_v30, %v892_v58  ;;  %v914_v13 = vmul.f32 %v912_v17, %v2585_v24  ;;  %v1009_v54 = vadd.f32 %v3116_v33, %v3115_v26  ;;  %v2789_v9 = vld [vmem:[%s3122_s26 + $0x10] sm:$0xff]  ;;  %v2821_v33 = vld [vmem:[%s3122_s26] sm:$0xff] }
 0x13a   : > { %v1010_v37 = vadd.f32 %v3118_v14, %v3117_v55  ;;  %v3119_v61 = vstv %s2118_s23  ;;  %v855_v16 = vadd.f32 %v854_v23, %v853_v40  ;;  %v1024_v48 = vstv %s2745_s6  ;;  %s2786_s23 = sld [smem:[#allocation9 + $0x380]]  ;;  %v2806_v23 = vpop.permute.xlu1 %1109  ;;  %s3128_s6 = smov 127  }
 0x13b   : > { %v1019_v62 = vmul.f32 %v3119_v61, %v2406_v41  ;;  %v903_v29 = vadd.f32 %v901_v51, %v897_v45  ;;  %v904_v2 = vadd.f32 %v902_v1, %v898_v10  ;;  %v1015_v11 = vadd.f32 %v3120_v49, %v1009_v54  ;;  %v3123_v41 = vld [vmem:[#allocation44_spill] sm:$0xff]  ;;  %v2827_v54 = vpop.permute.xlu2 %1111 }
 0x13c   : > { %v1016_v36 = vadd.f32 %v3121_v63, %v1010_v37  ;;  %v1025_v21 = vmul.f32 %v1610_v15, %v1024_v48  ;;  %v1026_v25 = vmul.f32 %v1611_v42, %v1024_v48  ;;  %856 = vadd.xlane.f32.xlu1 %v855_v16  ;;  %v1030_v38 = vstv %s2750_s19  ;;  %v2829_v37 = vpop.permute.xlu0 %1127  ;;  %v1597_v61 = vld [vmem:[%s3126_s17] ss:$0 sm:$0xff]  ;;  %s1803_s19 = smov 125  }
 0x13d   : > { %v909_v12 = vadd.f32 %v907_v32, %v903_v29  ;;  %v910_v47 = vadd.f32 %v908_v6, %v904_v2  ;;  %v1036_v7 = vstv %s2754_s27  ;;  %v1021_v35 = vadd.f32 %v1019_v62, %v1015_v11  ;;  %v1596_v2 = vld [vmem:[%s3127_s7] ss:$0 sm:$0xff]  ;;  %v1595_v11 = vld [vmem:[%s3126_s17 + $0x1] ss:$0 sm:$0xff]  ;;  %s1804_s7 = smov 124   ;;  %s1725_s27 = scalar_lea.hbm %s3133_s16, 32 }
 0x13e   : > { %v1022_v60 = vadd.f32 %v3123_v41, %v1016_v36  ;;  %v1031_v53 = vmul.f32 %v1030_v38, %v2467_v43  ;;  %v1032_v18 = vmul.f32 %v1030_v38, %v2478_v28  ;;  %v1037_v15 = vmul.f32 %v1036_v7, %v2482_v34  ;;  %1148 = vrot.lane.b32.xlu0 %v2789_v9, %s1797_s30  ;;  %v1599_v38 = vld [vmem:[%s3126_s17 + $0x3] ss:$0 sm:$0xff] }
 0x13f   : > { %v915_v22 = vadd.f32 %v913_v44, %v909_v12  ;;  %v916_v27 = vadd.f32 %v914_v13, %v910_v47  ;;  %v1027_v30 = vadd.f32 %v1025_v21, %v1021_v35  ;;  %v1038_v59 = vmul.f32 %v1036_v7, %v2486_v39 }
 0x140   : > { %v1028_v46 = vadd.f32 %v1026_v25, %v1022_v60  ;;  %v1042_v31 = vstv %s2763_s28  ;;  %v1048_v28 = vstv %s2766_s9  ;;  %v1054_v17 = vstv %s2786_s23  ;;  %v1594_v25 = vld [vmem:[%s3126_s17 + $0x2] ss:$0 sm:$0xff]  ;;  %s3129_s9 = sld [smem:[#allocation51_spill]] }
 0x141   : > { %v919_v43 = vadd.f32 %v918_v4, %v915_v22  ;;  %v920_v50 = vadd.f32 %v918_v4, %v916_v27  ;;  %v1033_v56 = vadd.f32 %v1031_v53, %v1027_v30  ;;  %v1043_v52 = vmul.f32 %v1042_v31, %v2544_v19  ;;  %v2802_v4 = vld [vmem:[%s3122_s26 + $0x8] sm:$0xff]  ;;  %v1600_v22 = vld [vmem:[%s3126_s17 + $0x4] ss:$0 sm:$0xff] }
 0x142   : > { %v1034_v34 = vadd.f32 %v1032_v18, %v1028_v46  ;;  %v1044_v51 = vmul.f32 %v1042_v31, %v2548_v20  ;;  %v1049_v58 = vmul.f32 %v1048_v28, %v2583_v3  ;;  %v1050_v39 = vmul.f32 %v1048_v28, %v2585_v24  ;;  %v1114_v13 = vpop.permute.xlu1 %1113  ;;  %v1598_v28 = vld [vmem:[%s3126_s17 + $0x6] ss:$0 sm:$0xff] }
 0x143   : > { %v921_v1 = vmax.f32 %v919_v43, 0.0  ;;  %v922_v57 = vmax.f32 %v920_v50, 0.0  ;;  %v1039_v0 = vadd.f32 %v1037_v15, %v1033_v56  ;;  %vm1115_vm1 = vcmp.lt.s32.totalorder %v2070_v5, 4  ;;  %v1601_v15 = vld [vmem:[%s3126_s17 + $0x5] ss:$0 sm:$0xff] }
 0x144   : > { %v1040_v8 = vadd.f32 %v1038_v59, %v1034_v34  ;;  %v2812_v26 = vsel %vm1115_vm1, %v1114_v13, %v2806_v23  ;;  %v1798_v16 = vmov 2   ;;  %v1799_v29 = vmov 1  }
 0x145   : > { %v923_v32 = vadd.f32 %v922_v57, %v921_v1  ;;  %v1045_v40 = vadd.f32 %v1043_v52, %v1039_v0  ;;  %1585 = vset.pattern.permute.xlu1 %v1798_v16  ;;  %1584 = vset.pattern.permute.xlu0 %v1799_v29  ;;  %v1800_v49 = vmov 0   ;;  %v1602_v1 = vld [vmem:[%s3126_s17 + $0x7] ss:$0 sm:$0xff]  ;;  %vm1133_vm3 = vcmp.lt.s32.totalorder %v2070_v5, 3 }
 0x146   : > { %v1046_v6 = vadd.f32 %v1044_v51, %v1040_v8  ;;  %1163 = vrot.lane.b32.xlu0 %v2802_v4, %s3124_s25  ;;  %1583 = vset.pattern.permute.xlu2 %v1800_v49  ;;  %v1607_v16 = vld [vmem:[%s3129_s9 + $0x2] ss:$0 sm:$0xff]  ;;  %vm1207_vm5 = vcmp.lt.s32.totalorder %v2070_v5, 126  ;;  %vm1241_vm7 = vcmp.lt.s32.totalorder %v2070_v5, 124 }
 0x147   : > { %924 = vadd.xlane.f32.xlu2 %v923_v32  ;;  %v1051_v19 = vadd.f32 %v1049_v58, %v1045_v40  ;;  %v1802_v40 = vmov 3  }
 0x148   : > { %v1052_v20 = vadd.f32 %v1050_v39, %v1046_v6 }
 0x149   : > { %v1055_v45 = vadd.f32 %v1054_v17, %v1051_v19 }
 0x14a   : > { %v1056_v10 = vadd.f32 %v1054_v17, %v1052_v20 }
 0x14b   : > { %v1057_v3 = vmax.f32 %v1055_v45, 0.0 }
 0x14c   : > { %v1058_v44 = vmax.f32 %v1056_v10, 0.0 }
 0x14e   : > { %v1059_v24 = vadd.f32 %v1058_v44, %v1057_v3 }
 0x150   : > { %1060 = vadd.xlane.f32.xlu1 %v1059_v24 }
 0x15f   : > { %1131 = vrot.lane.b32.xlu2 %v2789_v9, %s3125_s15 }
 0x167   : > { %1146 = vrot.lane.b32.xlu2 %v2802_v4, %s1797_s30 }
 0x169   : > { %1129 = vrot.lane.b32.xlu1 %v2802_v4, %s3125_s15 }
 0x16f   : > { %1161 = vrot.lane.b32.xlu2 %v2821_v33, %s3124_s25 }
 0x171   : > { %1144 = vrot.lane.b32.xlu1 %v2821_v33, %s1797_s30  ;;  %s3130_s30 = sld [smem:[#allocation52_spill]] }
 0x18b   : > { %v653_v55 = vpop.xlane.xlu2 %652  ;;  %v721_v36 = vpop.xlane.xlu0 %720 }
 0x18c   : > { %v654_v63 = vmul.f32 0.00390625, %v653_v55  ;;  %v722_v12 = vmul.f32 0.00390625, %v721_v36  ;;  %v1604_v55 = vld [vmem:[%s3129_s9] ss:$0 sm:$0xff] }
 0x18e   : > { %v585_v14 = vpop.xlane.xlu1 %584  ;;  %v657_v47 = vmul.f32 %v1595_v11, %v654_v63  ;;  %v725_v60 = vmul.f32 %v1594_v25, %v722_v12 }
 0x18f   : > { %v586_v62 = vmul.f32 0.00390625, %v585_v14  ;;  %v1603_v14 = vld [vmem:[%s3130_s30] ss:$0 sm:$0xff] }
 0x191   : > { %v589_v48 = vmul.f32 %v1597_v61, %v586_v62  ;;  %v1606_v62 = vld [vmem:[%s3129_s9 + $0x1] ss:$0 sm:$0xff] }
 0x193   : > { %v590_v42 = vadd.f32 %v1596_v2, %v589_v48 }
 0x195   : > { %v658_v35 = vadd.f32 %v657_v47, %v590_v42  ;;  %v1805_v47 = vmov 4  }
 0x197   : > { %v726_v18 = vadd.f32 %v725_v60, %v658_v35  ;;  %v1808_v35 = vmov 7  }
 0x19d   : > { %v993_v59 = vpop.xlane.xlu0 %992 }
 0x19e   : > { %v994_v56 = vmul.f32 0.00390625, %v993_v59 }
 0x1a0   : > { %v997_v51 = vmul.f32 %v1598_v28, %v994_v56 }
 0x1a6   : > { %v789_v21 = vpop.xlane.xlu2 %788 }
 0x1a7   : > { %v790_v7 = vmul.f32 0.00390625, %v789_v21 }
 0x1a9   : > { %v793_v53 = vmul.f32 %v1599_v38, %v790_v7  ;;  %v1806_v38 = vmov 5   ;;  %v1807_v7 = vmov 6  }
 0x1ab   : > { %v794_v30 = vadd.f32 %v793_v53, %v726_v18 }
 0x1af   : > { %v857_v41 = vpop.xlane.xlu1 %856 }
 0x1b0   : > { %v858_v27 = vmul.f32 0.00390625, %v857_v41  ;;  %v2877_v19 = vpop.permute.xlu0 %1148  ;;  %v1809_v41 = vmov 8  }
 0x1b2   : > { %v861_v43 = vmul.f32 %v1600_v22, %v858_v27 }
 0x1b4   : > { %v862_v34 = vadd.f32 %v861_v43, %v794_v30 }
 0x1b8   : > { %v1164_v45 = vpop.permute.xlu0 %1163 }
 0x1ba   : > { %v925_v46 = vpop.xlane.xlu2 %924 }
 0x1bb   : > { %v926_v31 = vmul.f32 0.00390625, %v925_v46 }
 0x1bd   : > { %v929_v50 = vmul.f32 %v1601_v15, %v926_v31  ;;  %v1116_v31 = vsel %vm1115_vm1, %v2806_v23, %v2827_v54 }
 0x1bf   : > { %v930_v52 = vadd.f32 %v929_v50, %v862_v34 }
 0x1c1   : > { %v998_v0 = vadd.f32 %v997_v51, %v930_v52 }
 0x1c2   : > { %v2873_v6 = vpop.permute.xlu2 %1131 }
 0x1c3   : > { %v1061_v57 = vpop.xlane.xlu1 %1060 }
 0x1c4   : > { %v1062_v8 = vmul.f32 0.00390625, %v1061_v57 }
 0x1c6   : > { %v1065_v58 = vmul.f32 %v1602_v1, %v1062_v8 }
 0x1c8   : > { %v1066_v39 = vadd.f32 %v1065_v58, %v998_v0 }
 0x1ca   : > { %1608 = vtanh.f32 %v1066_v39  ;;  %v2875_v17 = vpop.permute.xlu2 %1146 }
 0x1d0   : > { %v1609_v32 = vpop.eup %1608 }
 0x1d1   : > { %1092 = vperm.xlu1 %1585, %v1609_v32   ;;  %1084 = vperm.xlu0 %1584, %v1609_v32  }
 0x1d2   : > { %1076 = vperm.xlu2 %1583, %v1609_v32   ;;  %v2879_v20 = vpop.permute.xlu2 %1161 }
 0x1d3   : > { %v2884_v10 = vsel %vm425_vm6, %v2879_v20, %v1164_v45 }
 0x1d9   : > { %1165 = vrot.lane.b32.xlu1 %v2789_v9, %s3124_s25  ;;  %1201 = vrot.lane.b32.xlu0 %v2821_v33, %s1801_s5 }
 0x1da   : > { %1187 = vrot.lane.b32.xlu2 %v2802_v4, %s3128_s6 }
 0x1db   : > { %1586 = vset.pattern.permute.xlu2 %v1802_v40  ;;  %v1130_v44 = vpop.permute.xlu1 %1129 }
 0x1dc   : > { %v1134_v43 = vsel %vm1133_vm3, %v2829_v37, %v1130_v44 }
 0x1e1   : > { %1185 = vrot.lane.b32.xlu1 %v2821_v33, %s3128_s6 }
 0x1e2   : > { %1100 = vperm.xlu2 %1586, %v1609_v32  }
 0x1e3   : > { %v2886_v24 = vpop.permute.xlu1 %1144 }
 0x1e4   : > { %v1151_v57 = vsel %vm1150_vm4, %v2886_v24, %v2875_v17  ;;  %v1152_v0 = vsel %vm1150_vm4, %v2877_v19, %v2886_v24 }
 0x1e9   : > { %1189 = vrot.lane.b32.xlu1 %v2789_v9, %s3128_s6 }
 0x1ea   : > { %1205 = vrot.lane.b32.xlu2 %v2789_v9, %s1801_s5 }
 0x1eb   : > { %1587 = vset.pattern.permute.xlu2 %v1800_v49  ;;  %v1605_v49 = vld [vmem:[%s3129_s9 + $0x3] ss:$0 sm:$0xff] }
 0x1f1   : > { %1203 = vrot.lane.b32.xlu1 %v2802_v4, %s1801_s5  ;;  %s1721_s5 = scalar_lea.hbm %s1720_s8, 16 }
 0x1f2   : > { %1220 = vrot.lane.b32.xlu2 %v2802_v4, %s1803_s19  ;;  %p1722_p1 = scmp.ne.s32.totalorder %s1720_s8, %s1721_s5  ;;  %p1727_p11 = scmp.lt.s32.totalorder %s1725_s27, %s1721_s5 }
 0x1f4   : > { %p1723_p4 = pnand %p1722_p1, %p1924_p5  ;;  %p1728_p10 = por %p1727_p11, %p1726_p2 }
 0x1f6   : > { %p1724_p8 = pneg %p1723_p4 }
 0x1f8   : > { %p1729_p9 = pnand %p1728_p10, %p1724_p8 }
 0x1f9   : > { %1218 = vrot.lane.b32.xlu1 %v2821_v33, %s1803_s19 }
 0x22c   : > { %v1077_v3 = vpop.permute.xlu2 %1076 }
 0x22d   : > { %v1080_v61 = vmul.f32 %v1604_v55, %v1077_v3 }
 0x22f   : > { %v1081_v48 = vadd.f32 %v1603_v14, %v1080_v61 }
 0x234   : > { %v2888_v13 = vpop.permute.xlu2 %1187 }
 0x23c   : > { %v1101_v63 = vpop.permute.xlu2 %1100 }
 0x23d   : > { %v1104_v42 = vmul.f32 %v1605_v49, %v1101_v63 }
 0x243   : > { %v1085_v29 = vpop.permute.xlu0 %1084  ;;  %v1093_v2 = vpop.permute.xlu1 %1092 }
 0x244   : > { %v1088_v11 = vmul.f32 %v1606_v62, %v1085_v29  ;;  %v1096_v21 = vmul.f32 %v1607_v16, %v1093_v2  ;;  %v1206_v18 = vpop.permute.xlu2 %1205 }
 0x246   : > { %v1089_v36 = vadd.f32 %v1088_v11, %v1081_v48 }
 0x248   : > { %v1097_v25 = vadd.f32 %v1096_v21, %v1089_v36 }
 0x24a   : > { %v1105_v12 = vadd.f32 %v1104_v42, %v1097_v25 }
 0x24b   : > { %v1166_v60 = vpop.permute.xlu1 %1165  ;;  %v1202_v30 = vpop.permute.xlu0 %1201 }
 0x24c   : > { %1154 = vperm.xlu1 %1585, %v1105_v12   ;;  %1137 = vperm.xlu0 %1584, %v1105_v12   ;;  %v1221_v27 = vpop.permute.xlu2 %1220 }
 0x24d   : > { %1120 = vperm.xlu2 %1587, %v1105_v12  }
 0x253   : > { %v1186_v53 = vpop.permute.xlu1 %1185 }
 0x254   : > { %1222 = vrot.lane.b32.xlu1 %v2789_v9, %s1803_s19  ;;  %1235 = vrot.lane.b32.xlu0 %v2821_v33, %s1804_s7  ;;  %v1192_v55 = vsel %vm494_vm14, %v1186_v53, %v2888_v13 }
 0x255   : > { %1588 = vset.pattern.permute.xlu2 %v1802_v40  ;;  %1589 = vset.pattern.permute.xlu0 %v1805_v47 }
 0x256   : > { %1170 = vperm.xlu2 %1588, %v1105_v12  }
 0x25b   : > { %v1190_v22 = vpop.permute.xlu1 %1189 }
 0x25c   : > { %1237 = vrot.lane.b32.xlu1 %v2802_v4, %s1804_s7  ;;  %1178 = vperm.xlu0 %1589, %v1105_v12  }
 0x25e   : > { %1590 = vset.pattern.permute.xlu2 %v1806_v38 }
 0x25f   : > { %1194 = vperm.xlu2 %1590, %v1105_v12  }
 0x263   : > { %v1204_v15 = vpop.permute.xlu1 %1203 }
 0x264   : > { %1591 = vset.pattern.permute.xlu0 %v1807_v7  ;;  %v1209_v49 = vsel %vm1207_vm5, %v1202_v30, %v1204_v15 }
 0x265   : > { %1211 = vperm.xlu0 %1591, %v1105_v12  }
 0x267   : > { %1592 = vset.pattern.permute.xlu2 %v1808_v35 }
 0x268   : > { %1228 = vperm.xlu2 %1592, %v1105_v12  }
 0x26b   : > { %v1219_v59 = vpop.permute.xlu1 %1218 }
 0x26d   : > { %1593 = vset.pattern.permute.xlu0 %v1809_v41 }
 0x26e   : > { %1245 = vperm.xlu0 %1593, %v1105_v12  }
 0x270   : > { %1239 = vrot.lane.b32.xlu2 %v2789_v9, %s1804_s7  ;;  %v1135_v9 = vsel %vm1133_vm3, %v2873_v6, %v2829_v37  ;;  %v1168_v37 = vsel %vm425_vm6, %v1166_v60, %v2879_v20  ;;  %v1191_v20 = vsel %vm494_vm14, %v2888_v13, %v1190_v22  ;;  %vm1224_vm6 = vcmp.lt.s32.totalorder %v2070_v5, 125 }
 0x271   : > { %v1226_v12 = vsel %vm1224_vm6, %v1219_v59, %v1221_v27 }
 0x2a7   : > { %v1121_v46 = vpop.permute.xlu2 %1120 }
 0x2a8   : > { %v1123_v56 = vmul.f32 %v1121_v46, %v2812_v26  ;;  %v1124_v34 = vmul.f32 %v1121_v46, %v1116_v31 }
 0x2b0   : > { %v1171_v52 = vpop.permute.xlu2 %1170 }
 0x2b1   : > { %v1173_v39 = vmul.f32 %v1171_v52, %v1168_v37  ;;  %v1174_v26 = vmul.f32 %v1171_v52, %v2884_v10 }
 0x2b9   : > { %v1195_v17 = vpop.permute.xlu2 %1194 }
 0x2ba   : > { %v1197_v10 = vmul.f32 %v1195_v17, %v1192_v55  ;;  %v1198_v14 = vmul.f32 %v1195_v17, %v1191_v20 }
 0x2be   : > { %v1138_v50 = vpop.permute.xlu0 %1137  ;;  %v1155_v28 = vpop.permute.xlu1 %1154 }
 0x2bf   : > { %v1140_v51 = vmul.f32 %v1138_v50, %v1135_v9  ;;  %v1141_v1 = vmul.f32 %v1138_v50, %v1134_v43  ;;  %v1157_v8 = vmul.f32 %v1155_v28, %v1152_v0  ;;  %v1158_v58 = vmul.f32 %v1155_v28, %v1151_v57 }
 0x2c1   : > { %v1142_v23 = vadd.f32 %v1140_v51, %v1123_v56  ;;  %v1143_v54 = vadd.f32 %v1141_v1, %v1124_v34 }
 0x2c2   : > { %v1229_v16 = vpop.permute.xlu2 %1228 }
 0x2c3   : > { %v1159_v32 = vadd.f32 %v1157_v8, %v1142_v23  ;;  %v1160_v40 = vadd.f32 %v1158_v58, %v1143_v54  ;;  %v1231_v38 = vmul.f32 %v1229_v16, %v1226_v12 }
 0x2c5   : > { %v1175_v6 = vadd.f32 %v1173_v39, %v1159_v32  ;;  %v1176_v45 = vadd.f32 %v1174_v26, %v1160_v40 }
 0x2c6   : > { %v1236_v3 = vpop.permute.xlu0 %1235  ;;  %v1223_v29 = vpop.permute.xlu1 %1222 }
 0x2c7   : > { %v1225_v13 = vsel %vm1224_vm6, %v1221_v27, %v1223_v29 }
 0x2c8   : > { %v1232_v7 = vmul.f32 %v1229_v16, %v1225_v13 }
 0x2ca   : > { %v1240_v36 = vpop.permute.xlu2 %1239 }
 0x2ce   : > { %v1179_v44 = vpop.permute.xlu0 %1178  ;;  %v1238_v21 = vpop.permute.xlu1 %1237 }
 0x2cf   : > { %v1181_v19 = vmul.f32 %v2821_v33, %v1179_v44  ;;  %v1182_v24 = vmul.f32 %v2802_v4, %v1179_v44  ;;  %v1208_v33 = vsel %vm1207_vm5, %v1204_v15, %v1206_v18  ;;  %v1242_v47 = vsel %vm1241_vm7, %v1238_v21, %v1240_v36 }
 0x2d0   : > { %v1243_v41 = vsel %vm1241_vm7, %v1236_v3, %v1238_v21 }
 0x2d1   : > { %v1183_v61 = vadd.f32 %v1181_v19, %v1175_v6  ;;  %v1184_v62 = vadd.f32 %v1182_v24, %v1176_v45 }
 0x2d3   : > { %v1199_v2 = vadd.f32 %v1197_v10, %v1183_v61  ;;  %v1200_v48 = vadd.f32 %v1198_v14, %v1184_v62 }
 0x2d7   : > { %v1212_v4 = vpop.permute.xlu0 %1211 }
 0x2d8   : > { %v1214_v11 = vmul.f32 %v1212_v4, %v1209_v49  ;;  %v1215_v63 = vmul.f32 %v1212_v4, %v1208_v33 }
 0x2da   : > { %v1216_v42 = vadd.f32 %v1214_v11, %v1199_v2  ;;  %v1217_v25 = vadd.f32 %v1215_v63, %v1200_v48 }
 0x2dc   : > { %v1233_v60 = vadd.f32 %v1231_v38, %v1216_v42  ;;  %v1234_v53 = vadd.f32 %v1232_v7, %v1217_v25 }
 0x2e0   : > { %v1246_v35 = vpop.permute.xlu0 %1245 }
 0x2e1   : > { %v1248_v18 = vmul.f32 %v1246_v35, %v1243_v41  ;;  %v1249_v22 = vmul.f32 %v1246_v35, %v1242_v47 }
 0x2e3   : > { %v1250_v5 = vadd.f32 %v1248_v18, %v1233_v60  ;;  %v1251_v27 = vadd.f32 %v1249_v22, %v1234_v53 }
 0x2e5   : > { %1252 = vst [vmem:[%s390_s24] sm:$0xff] %v1250_v5 }
 0x2e6   : > { %1253 = vst [vmem:[%s390_s24 + $0x8] sm:$0xff] %v1251_v27 }
 0x2e7   : > { %1732 = shalt.err (!%p1729_p9)
}
 0x2e8   : > { %1500 = dma.vmem_to_hbm [thread:$0]  (%p1924_p5), %s1269_s18, 256, %s1271_s0, %s1255_s1  }
 0x2e9 PF: > { %s3136_s23 = sld [smem:[#allocation17_spill]] }
 0x2ea   : > { %s3138_s25 = sld [smem:[#allocation20_spill]] }
 0x2ef   : > { %s1282_s15 = sand.u32 1, %s3136_s23  }
 0x2f0   : > { %p3139_p12 = scmp.ge.s32.totalorder %s3138_s25, 2  ;;  %s1283_s3 = scalar_lea.sflag [#allocation4], %s1282_s15 }
 0x2f2   : > { %p1517_p13 = pnand %p3139_p12, %p1890_p6 }
 0x2f4   : > { %p1518_p0 = pneg %p1517_p13 }
 0x2f6   : > { %1766 = dma.done.wait (%p1518_p0), %s1283_s3, 256  }
 0x2f7   : > { %1768 = vsyncadd (%p1518_p0), %s1283_s3, 4294967040  ;;  %s3140_s30 = sld [smem:[#allocation23_spill]] }
 0x2f8   : > { %s3141_s27 = sld [smem:[#allocation18_spill]] }
 0x2f9   : > { %s3142_s28 = sld [smem:[#allocation19_spill]] }
 0x2fa   : > { %s3143_s29 = sld [smem:[#allocation24_spill]] }
 0x2fd   : > { %p26_p3 = scmp.ge.s32.totalorder %s3140_s30, 4  }
 0x2ff   :  { %28 = sbr.rel (!%p26_p3) target bundleno = 19 (0x13), region = 119 }
 0x304   :  { %1289 = vsyncpa [#allocation3], 1 }
 0x305   :  { %1291 = vsyncpa [#allocation3 + $0x1], 1 }
 0x306   :  { %1292 = vsyncpa [#allocation7], 1 }
 0x307   :  { %1294 = vsyncpa [#allocation7 + $0x1], 1 }
 0x308   :  { %1295 = vsyncpa [#allocation4], 1 }
 0x309   :  { %1297 = vsyncpa [#allocation4 + $0x1], 1 }
 0x30a   :  { %1298 = vsyncpa [#allocation5], 1 }
 0x30b   :  { %1300 = vsyncpa [#allocation5 + $0x1], 1 }
 0x30c   :  { %1301 = vsyncpa [#allocation10], 1 }

</bundles_post_ra>
